<compile_context>
chip_gen: v7x
topology: tpu7x:2x2x1
jax: 0.10.0
libtpu: 0.0.40
codegen_flags: <defaults>
</compile_context>

<pallas_src>
import jax
import jax.numpy as jnp
import numpy as np
from jax.experimental import pallas as pl
from jax.experimental.pallas import tpu as pltpu


# ----------------------------------------------------------------------------
# Fused Pallas kernel: whole CNN forward for TB samples per grid step.
# Every layer is a single MXU matmul (bias folded in), activation in f32.
# ----------------------------------------------------------------------------
def fused_cnn_kernel(x_ref, w1_ref, w2_ref, w3_ref, f1_ref, f2_ref, f3_ref,
                     o_ref):
    def mm(a, w_ref):
        # f32 accumulation regardless of operand dtype.
        return jnp.dot(a.astype(w_ref.dtype), w_ref[...],
                       preferred_element_type=jnp.float32)

    relu = lambda v: jnp.maximum(v, 0.0)

    a = relu(mm(x_ref[...], w1_ref))   # conv1 + ReLU   (TB, 28*3*8 + 1)
    a = relu(mm(a, w2_ref))            # conv2 + ReLU   (TB, 24*2*8 + 1)
    a = relu(mm(a, w3_ref))            # conv3 + ReLU   (TB, 20*1*8 + 1)
    a = relu(mm(a, f1_ref))            # fc1   + ReLU   (TB, 256 + 1)
    # TODO(synk): nn.Dropout(p=0.0) is the identity and is omitted.
    a = relu(mm(a, f2_ref))            # fc2   + ReLU   (TB, 16 + 1)
    o_ref[...] = jnp.tanh(mm(a, f3_ref))   # fc3 + Tanh  (TB, dout)


# ----------------------------------------------------------------------------
# pallas_call wrapper
# ----------------------------------------------------------------------------
def cnn_forward(x_nchw, kp, tb=128, compute_dtype=jnp.float32):
    """Fused CNN forward.  `kp` are the pre-packed kernel parameters."""
    B, Cin, H, W = x_nchw.shape

    # NCHW -> NHWC, flatten (H, W, C) into lanes, append the constant-1 lane
    # that drives every folded bias row.
    x = jnp.transpose(x_nchw, (0, 2, 3, 1)).reshape(B, H * W * Cin)
    x = jnp.concatenate([x.astype(jnp.float32), jnp.ones((B, 1), jnp.float32)],
                        axis=-1).astype(compute_dtype)

    tb = int(min(tb, B))
    grid = int(pl.cdiv(B, tb))
    Bp = grid * tb
    if Bp != B:
        x = jnp.pad(x, ((0, Bp - B), (0, 0)))   # padded rows produce zeros

    names = ("w1", "w2", "w3", "f1", "f2", "f3")
    weights = [kp[n].astype(compute_dtype) for n in names]
    dout = kp["f3"].shape[1]

    out = pl.pallas_call(
        fused_cnn_kernel,
        out_shape=jax.ShapeDtypeStruct((Bp, dout), jnp.float32),
        grid=(grid,),
        in_specs=[pl.BlockSpec((tb, x.shape[1]), lambda i: (i, 0))]
        + [pl.BlockSpec(w.shape, lambda i: (0, 0)) for w in weights],
        out_specs=pl.BlockSpec((tb, dout), lambda i: (i, 0)),
        compiler_params=pltpu.CompilerParams(
            dimension_semantics=("parallel",)),
    )(x, *weights)
    return out[:B]


# ----------------------------------------------------------------------------
# Host-side parameter packing (one-time, numpy)
# ----------------------------------------------------------------------------
def _conv_band_matrix(w_oihw, hin, win, pad_w):
    """Lower a PyTorch OIHW conv (stride 1, valid in H, pad_w on W) into a
    banded matrix mapping flattened NHWC input lanes -> flattened NHWC output
    lanes, so the conv becomes a single matmul with batch as M."""
    w = np.asarray(w_oihw, np.float32)
    cout, cin, kh, kw = w.shape
    hout = hin - kh + 1
    wout = win + 2 * pad_w - kw + 1
    mat = np.zeros((hin * win * cin, hout * wout * cout), np.float32)
    for ho in range(hout):
        for wo in range(wout):
            col = (ho * wout + wo) * cout
            for dh in range(kh):
                hi = ho + dh
                for dw in range(kw):
                    wi = wo + dw - pad_w
                    if wi < 0 or wi >= win:
                        continue          # tap lands on zero width-padding
                    for ci in range(cin):
                        row = (hi * win + wi) * cin + ci
                        mat[row, col:col + cout] = w[:, ci, dh, dw]
    return mat


def _augment(mat, bias, passthrough=True):
    """Append a bias row (driven by the constant-1 lane) and, unless this is
    the last layer, a passthrough column that regenerates the 1-lane (ReLU(1)=1
    keeps it alive through the activations)."""
    k, n = mat.shape
    out = np.zeros((k + 1, n + (1 if passthrough else 0)), np.float32)
    out[:k, :n] = mat
    out[k, :n] = np.asarray(bias, np.float32)
    if passthrough:
        out[k, n] = 1.0
    return jnp.asarray(out)


def init_params(key, *, channel_in=1, channel_out=1, length_data=32,
                length_label=1, filter_size=5, width=3):
    C = 8 * channel_in
    h1 = length_data - filter_size + 1
    h2 = h1 - filter_size + 1
    h3 = h2 - filter_size + 1
    w1o = width + 2 - 3 + 1            # conv1: padding=(0,1), kw=3
    w2o = w1o - 2 + 1
    w3o = w2o - 2 + 1
    flat = h3 * w3o * C

    keys = jax.random.split(key, 12)

    def u(k, shape, fan_in):
        bound = 1.0 / np.sqrt(fan_in)
        return jax.random.uniform(k, shape, jnp.float32, -bound, bound)

    # Raw parameters (conv: OIHW; linears stored as (in, out)).
    w1 = u(keys[0], (C, channel_in, filter_size, 3), channel_in * filter_size * 3)
    b1 = u(keys[1], (C,), channel_in * filter_size * 3)
    w2 = u(keys[2], (C, C, filter_size, 2), C * filter_size * 2)
    b2 = u(keys[3], (C,), C * filter_size * 2)
    w3 = u(keys[4], (C, C, filter_size, 2), C * filter_size * 2)
    b3 = u(keys[5], (C,), C * filter_size * 2)
    fc1_w = u(keys[6], (flat, 256), flat)
    fc1_b = u(keys[7], (256,), flat)
    # TODO(synk): reference module declares nn.Linear(64, 16) after a 256-wide
    # layer, which is shape-inconsistent and would raise in PyTorch; we use
    # in_features=256 so the forward is runnable.
    fc2_w = u(keys[8], (256, 16), 256)
    fc2_b = u(keys[9], (16,), 256)
    fc3_w = u(keys[10], (16, length_label * channel_out), 16)
    fc3_b = u(keys[11], (length_label * channel_out,), 16)

    # Pack for the kernel: convs -> banded matrices, biases folded in.
    band1 = _conv_band_matrix(w1, length_data, width, pad_w=1)
    band2 = _conv_band_matrix(w2, h1, w1o, pad_w=0)
    band3 = _conv_band_matrix(w3, h2, w2o, pad_w=0)

    # fc1 rows permuted from PyTorch's NCHW flatten (c, h, w) to the kernel's
    # NHWC lane order (h, w, c) produced by the conv3 banded matrix.
    fc1_perm = (np.asarray(fc1_w, np.float32)
                .reshape(C, h3, w3o, 256).transpose(1, 2, 0, 3)
                .reshape(flat, 256))

    kernel = dict(
        w1=_augment(band1, np.tile(np.asarray(b1, np.float32), h1 * w1o)),
        w2=_augment(band2, np.tile(np.asarray(b2, np.float32), h2 * w2o)),
        w3=_augment(band3, np.tile(np.asarray(b3, np.float32), h3 * w3o)),
        f1=_augment(fc1_perm, fc1_b),
        f2=_augment(np.asarray(fc2_w, np.float32), fc2_b),
        f3=_augment(np.asarray(fc3_w, np.float32), fc3_b, passthrough=False),
    )
    raw = dict(w1=w1, b1=b1, w2=w2, b2=b2, w3=w3, b3=b3,
               fc1_w=fc1_w, fc1_b=fc1_b, fc2_w=fc2_w, fc2_b=fc2_b,
               fc3_w=fc3_w, fc3_b=fc3_b)
    return dict(kernel=kernel, raw=raw)


# ----------------------------------------------------------------------------
# Pure-JAX reference (HIGHEST precision) matching the PyTorch forward
# ----------------------------------------------------------------------------
def reference_forward(x_nchw, raw):
    P = jax.lax.Precision.HIGHEST

    def conv(x, w, b, pad_w):
        y = jax.lax.conv_general_dilated(
            x, w, window_strides=(1, 1),
            padding=((0, 0), (pad_w, pad_w)),
            dimension_numbers=("NCHW", "OIHW", "NCHW"), precision=P)
        return jnp.maximum(y + b[None, :, None, None], 0.0)

    out = conv(x_nchw, raw["w1"], raw["b1"], 1)
    out = conv(out, raw["w2"], raw["b2"], 0)
    out = conv(out, raw["w3"], raw["b3"], 0)
    B = out.shape[0]
    flat = out.reshape(B, -1)                         # PyTorch NCHW flatten
    h = jnp.maximum(jnp.dot(flat, raw["fc1_w"], precision=P) + raw["fc1_b"], 0.0)
    h = jnp.maximum(jnp.dot(h, raw["fc2_w"], precision=P) + raw["fc2_b"], 0.0)
    return jnp.tanh(jnp.dot(h, raw["fc3_w"], precision=P) + raw["fc3_b"])


if __name__ == "__main__":
    # Small, consistent shapes: batch=16, channel_in=1, length_data=32,
    # filter_size=5, width=3  ->  x: (16, 1, 32, 3), preds: (16, 1).
    # tb=8 exercises the batch-blocked grid (2 steps, "parallel").
    B, Cin, L, W = 16, 1, 32, 3
    key = jax.random.PRNGKey(0)
    pkey, xkey = jax.random.split(key)
    params = init_params(pkey, channel_in=Cin, channel_out=1, length_data=L,
                         length_label=1, filter_size=5, width=W)
    x = jax.random.normal(xkey, (B, Cin, L, W), jnp.float32)

    preds = jax.block_until_ready(cnn_forward(x, params["kernel"], tb=8))
    ref = jax.block_until_ready(reference_forward(x, params["raw"]))
    np.testing.assert_allclose(np.asarray(preds), np.asarray(ref),
                               rtol=1e-4, atol=1e-4)
    assert preds.shape == (B, 1) and preds.dtype == jnp.float32
    print("KERNEL_OK")
</pallas_src>

<mosaic_0001>
module attributes {stable_mosaic.version = 11 : i64} {
  func.func @fused_cnn_kernel(%arg0: i32, %arg1: memref<8x97xf32, #tpu.memory_space<vmem>>, %arg2: memref<97x673xf32, #tpu.memory_space<vmem>>, %arg3: memref<673x385xf32, #tpu.memory_space<vmem>>, %arg4: memref<385x161xf32, #tpu.memory_space<vmem>>, %arg5: memref<161x257xf32, #tpu.memory_space<vmem>>, %arg6: memref<257x17xf32, #tpu.memory_space<vmem>>, %arg7: memref<17x1xf32, #tpu.memory_space<vmem>>, %arg8: memref<8x1xf32, #tpu.memory_space<vmem>>) attributes {dimension_semantics = [#tpu.dimension_semantics<parallel>], iteration_bounds = array<i64: 2>, scalar_prefetch = 0 : i64, scratch_operands = 0 : i64, tpu.core_type = #tpu.core_type<tc>, window_params = [{transform_indices = @transform_0, window_bounds = array<i64: 8, 97>}, {pipeline_mode = #tpu.pipeline_mode<synchronous>, transform_indices = @transform_1, window_bounds = array<i64: 97, 673>}, {pipeline_mode = #tpu.pipeline_mode<synchronous>, transform_indices = @transform_2, window_bounds = array<i64: 673, 385>}, {pipeline_mode = #tpu.pipeline_mode<synchronous>, transform_indices = @transform_3, window_bounds = array<i64: 385, 161>}, {pipeline_mode = #tpu.pipeline_mode<synchronous>, transform_indices = @transform_4, window_bounds = array<i64: 161, 257>}, {pipeline_mode = #tpu.pipeline_mode<synchronous>, transform_indices = @transform_5, window_bounds = array<i64: 257, 17>}, {pipeline_mode = #tpu.pipeline_mode<synchronous>, transform_indices = @transform_6, window_bounds = array<i64: 17, 1>}, {transform_indices = @transform_7, window_bounds = array<i64: 8, 1>}]} {
    %c0 = arith.constant 0 : index
    %c0_0 = arith.constant 0 : index
    %0 = vector.load %arg1[%c0, %c0_0] : memref<8x97xf32, #tpu.memory_space<vmem>>, vector<8x97xf32>
    %c0_1 = arith.constant 0 : index
    %c0_2 = arith.constant 0 : index
    %1 = vector.load %arg2[%c0_1, %c0_2] : memref<97x673xf32, #tpu.memory_space<vmem>>, vector<97x673xf32>
    %cst = arith.constant dense<0.000000e+00> : vector<8x673xf32>
    %2 = tpu.matmul %0, %1, %cst {dimension_numbers = #tpu.dot_dimension_numbers<[1], [0], [0], [1], [0, 0, 1, 1], [], []>} : vector<8x97xf32>, vector<97x673xf32>, vector<8x673xf32> -> vector<8x673xf32>
    %cst_3 = arith.constant 0.000000e+00 : f32
    %3 = vector.broadcast %cst_3 : f32 to vector<8x673xf32>
    %4 = arith.maximumf %2, %3 : vector<8x673xf32>
    %c0_4 = arith.constant 0 : index
    %c0_5 = arith.constant 0 : index
    %5 = vector.load %arg3[%c0_4, %c0_5] : memref<673x385xf32, #tpu.memory_space<vmem>>, vector<673x385xf32>
    %cst_6 = arith.constant dense<0.000000e+00> : vector<8x385xf32>
    %6 = tpu.matmul %4, %5, %cst_6 {dimension_numbers = #tpu.dot_dimension_numbers<[1], [0], [0], [1], [0, 0, 1, 1], [], []>} : vector<8x673xf32>, vector<673x385xf32>, vector<8x385xf32> -> vector<8x385xf32>
    %cst_7 = arith.constant 0.000000e+00 : f32
    %7 = vector.broadcast %cst_7 : f32 to vector<8x385xf32>
    %8 = arith.maximumf %6, %7 : vector<8x385xf32>
    %c0_8 = arith.constant 0 : index
    %c0_9 = arith.constant 0 : index
    %9 = vector.load %arg4[%c0_8, %c0_9] : memref<385x161xf32, #tpu.memory_space<vmem>>, vector<385x161xf32>
    %cst_10 = arith.constant dense<0.000000e+00> : vector<8x161xf32>
    %10 = tpu.matmul %8, %9, %cst_10 {dimension_numbers = #tpu.dot_dimension_numbers<[1], [0], [0], [1], [0, 0, 1, 1], [], []>} : vector<8x385xf32>, vector<385x161xf32>, vector<8x161xf32> -> vector<8x161xf32>
    %cst_11 = arith.constant 0.000000e+00 : f32
    %11 = vector.broadcast %cst_11 : f32 to vector<8x161xf32>
    %12 = arith.maximumf %10, %11 : vector<8x161xf32>
    %c0_12 = arith.constant 0 : index
    %c0_13 = arith.constant 0 : index
    %13 = vector.load %arg5[%c0_12, %c0_13] : memref<161x257xf32, #tpu.memory_space<vmem>>, vector<161x257xf32>
    %cst_14 = arith.constant dense<0.000000e+00> : vector<8x257xf32>
    %14 = tpu.matmul %12, %13, %cst_14 {dimension_numbers = #tpu.dot_dimension_numbers<[1], [0], [0], [1], [0, 0, 1, 1], [], []>} : vector<8x161xf32>, vector<161x257xf32>, vector<8x257xf32> -> vector<8x257xf32>
    %cst_15 = arith.constant 0.000000e+00 : f32
    %15 = vector.broadcast %cst_15 : f32 to vector<8x257xf32>
    %16 = arith.maximumf %14, %15 : vector<8x257xf32>
    %c0_16 = arith.constant 0 : index
    %c0_17 = arith.constant 0 : index
    %17 = vector.load %arg6[%c0_16, %c0_17] : memref<257x17xf32, #tpu.memory_space<vmem>>, vector<257x17xf32>
    %cst_18 = arith.constant dense<0.000000e+00> : vector<8x17xf32>
    %18 = tpu.matmul %16, %17, %cst_18 {dimension_numbers = #tpu.dot_dimension_numbers<[1], [0], [0], [1], [0, 0, 1, 1], [], []>} : vector<8x257xf32>, vector<257x17xf32>, vector<8x17xf32> -> vector<8x17xf32>
    %cst_19 = arith.constant 0.000000e+00 : f32
    %19 = vector.broadcast %cst_19 : f32 to vector<8x17xf32>
    %20 = arith.maximumf %18, %19 : vector<8x17xf32>
    %c0_20 = arith.constant 0 : index
    %c0_21 = arith.constant 0 : index
    %21 = vector.load %arg7[%c0_20, %c0_21] : memref<17x1xf32, #tpu.memory_space<vmem>>, vector<17x1xf32>
    %cst_22 = arith.constant dense<0.000000e+00> : vector<8x1xf32>
    %22 = tpu.matmul %20, %21, %cst_22 {dimension_numbers = #tpu.dot_dimension_numbers<[1], [0], [0], [1], [0, 0, 1, 1], [], []>} : vector<8x17xf32>, vector<17x1xf32>, vector<8x1xf32> -> vector<8x1xf32>
    %23 = math.tanh %22 : vector<8x1xf32>
    %c0_23 = arith.constant 0 : index
    %c0_24 = arith.constant 0 : index
    %24 = vector.load %arg8[%c0_23, %c0_24] : memref<8x1xf32, #tpu.memory_space<vmem>>, vector<8x1xf32>
    tpu.vector_store %arg8[%c0_23, %c0_24], %23 {strides = array<i32>} : memref<8x1xf32, #tpu.memory_space<vmem>>, vector<8x1xf32>,
    return
  }
  func.func @transform_0(%arg0: i32) -> (i32, i32) {
    %c0_i32 = arith.constant 0 : i32
    %c0_i32_0 = arith.constant 0 : i32
    return %arg0, %c0_i32 : i32, i32
  }
  func.func @transform_1(%arg0: i32) -> (i32, i32) {
    %c0_i32 = arith.constant 0 : i32
    %c0_i32_0 = arith.constant 0 : i32
    %c0_i32_1 = arith.constant 0 : i32
    return %c0_i32, %c0_i32_0 : i32, i32
  }
  func.func @transform_2(%arg0: i32) -> (i32, i32) {
    %c0_i32 = arith.constant 0 : i32
    %c0_i32_0 = arith.constant 0 : i32
    %c0_i32_1 = arith.constant 0 : i32
    return %c0_i32, %c0_i32_0 : i32, i32
  }
  func.func @transform_3(%arg0: i32) -> (i32, i32) {
    %c0_i32 = arith.constant 0 : i32
    %c0_i32_0 = arith.constant 0 : i32
    %c0_i32_1 = arith.constant 0 : i32
    return %c0_i32, %c0_i32_0 : i32, i32
  }
  func.func @transform_4(%arg0: i32) -> (i32, i32) {
    %c0_i32 = arith.constant 0 : i32
    %c0_i32_0 = arith.constant 0 : i32
    %c0_i32_1 = arith.constant 0 : i32
    return %c0_i32, %c0_i32_0 : i32, i32
  }
  func.func @transform_5(%arg0: i32) -> (i32, i32) {
    %c0_i32 = arith.constant 0 : i32
    %c0_i32_0 = arith.constant 0 : i32
    %c0_i32_1 = arith.constant 0 : i32
    return %c0_i32, %c0_i32_0 : i32, i32
  }
  func.func @transform_6(%arg0: i32) -> (i32, i32) {
    %c0_i32 = arith.constant 0 : i32
    %c0_i32_0 = arith.constant 0 : i32
    %c0_i32_1 = arith.constant 0 : i32
    return %c0_i32, %c0_i32_0 : i32, i32
  }
  func.func @transform_7(%arg0: i32) -> (i32, i32) {
    %c0_i32 = arith.constant 0 : i32
    %c0_i32_0 = arith.constant 0 : i32
    return %arg0, %c0_i32 : i32, i32
  }
}

</mosaic_0001>

<bundles_post_ra>
// kernel: tpu_custom_call.1
= control target key start
LH: loop header
LB: loop body
LE: loop exit
PB: predicated region body
PF: predicated region fallthrough
CT: control target
= control target key end

     0   :  { %s2941_s24 = smov 0   ;;  %s4883_s0 = inlined_call_operand.vmem [shape: f32[16,97], index: 0, kind: input, shape index: {}]   ;;  %s4884_s1 = inlined_call_operand.vmem [shape: f32[97,673], index: 1, kind: input, shape index: {}]   ;;  %s4885_s2 = inlined_call_operand.vmem [shape: f32[673,385], index: 2, kind: input, shape index: {}]   ;;  %s4886_s3 = inlined_call_operand.vmem [shape: f32[385,161], index: 3, kind: input, shape index: {}]   ;;  %s4887_s4 = inlined_call_operand.vmem [shape: f32[161,257], index: 4, kind: input, shape index: {}]   ;;  %s4888_s5 = inlined_call_operand.vmem [shape: f32[257,17], index: 5, kind: input, shape index: {}]   ;;  %s4889_s6 = inlined_call_operand.vmem [shape: f32[17,1], index: 6, kind: input, shape index: {}]   ;;  %s4890_s7 = inlined_call_operand.vmem [shape: f32[16,1], index: 7, kind: output, shape index: {}]  }
   0x1 LB: > { %s2167_s25 = sadd.s32 4294967295, %s2896_s24   ;;  %p2171_p0 = scmp.ge.s32.totalorder %s2896_s24, 1  ;;  %s2896_s24 = sphi %s2941_s24, %s17_s24  }
   0x2   : > { %p236_p1 = scmp.lt.s32.totalorder %s2896_s24, 3 }
   0x4   : > { %p237_p2 = pnand %p2171_p0, %p236_p1 }
   0x5   : > { %v276_v0 = vld [vmem:[%s4884_s1 + $0x8] sm:$0xff] (!%p237_p2)  ;;  %v282_v1 = vld [vmem:[%s4884_s1 + $0x38] sm:$0xff] (!%p237_p2)  ;;  %v275_v2 = vld [vmem:[%s4884_s1] sm:$0xff] (!%p237_p2)  ;;  %v2898_v7 = vmov (!%p237_p2), 0.0   ;;  %p3034_p3 = scmp.lt.s32.totalorder (!%p237_p2), %s2167_s25, 1  ;;  %vm357_vm0 = vcmask (!%p237_p2), 1040384  }
   0x6   : > { %240 = sbr.rel (%p237_p2) target bundleno = 1518 (0x5ee), region = 48  ;;  %v2258_v3 = vpack.c.bf16 (!%p237_p2), %v282_v1, %v276_v0  ;;  %v281_v4 = vld [vmem:[%s4884_s1 + $0x30] sm:$0xff] (!%p237_p2)  ;;  %v288_v5 = vld [vmem:[%s4884_s1 + $0x68] sm:$0xff] (!%p237_p2)  ;;  %v294_v6 = vld [vmem:[%s4884_s1 + $0x98] sm:$0xff] (!%p237_p2)  ;;  %440 = vmatprep.mubr.f32.mxu0 (!%p237_p2), %v2898_v7  ;;  %511 = vmatprep.mubr.f32.mxu1 (!%p237_p2), %v2898_v7  ;;  %vm353_vm1 = vcmask (!%p237_p2), 793600   ;;  %vm935_vm2 = vcmask (!%p237_p2), 269312  }
   0x7   : > { %v2260_v8 = vpack.c.bf16 (!%p237_p2), %v281_v4, %v275_v2  ;;  %v2262_v9 = vpack.c.bf16 (!%p237_p2), %v294_v6, %v288_v5  ;;  %v287_v10 = vld [vmem:[%s4884_s1 + $0x60] sm:$0xff] (!%p237_p2)  ;;  %v293_v11 = vld [vmem:[%s4884_s1 + $0x90] sm:$0xff] (!%p237_p2)  ;;  %v300_v12 = vld [vmem:[%s4884_s1 + $0xc8] sm:$0xff] (!%p237_p2)  ;;  %vm1479_vm3 = vcmask (!%p237_p2), 7168   ;;  %vm2900_vm4 = vmmov (!%p237_p2), 0  }
   0x8   : > { %2259 = vmatprep.subr.bf16.mxu0 (!%p237_p2), %v2258_v3  ;;  %v306_v13 = vld [vmem:[%s4884_s1 + $0xf8] sm:$0xff] (!%p237_p2)  ;;  %v2264_v14 = vpack.c.bf16 (!%p237_p2), %v293_v11, %v287_v10  ;;  %v299_v16 = vld [vmem:[%s4884_s1 + $0xc0] sm:$0xff] (!%p237_p2)  ;;  %v305_v17 = vld [vmem:[%s4884_s1 + $0xf0] sm:$0xff] (!%p237_p2)  ;;  %vm2035_vm5 = vcmask (!%p237_p2), 138240  }
   0x9   : > { %2261 = vmatpush1.bf16.msra.mxu0 (!%p237_p2), %v2260_v8  ;;  %v2266_v15 = vpack.c.bf16 (!%p237_p2), %v306_v13, %v300_v12  ;;  %v312_v18 = vld [vmem:[%s4884_s1 + $0x128] sm:$0xff] (!%p237_p2)  ;;  %v318_v19 = vld [vmem:[%s4884_s1 + $0x158] sm:$0xff] (!%p237_p2)  ;;  %v311_v20 = vld [vmem:[%s4884_s1 + $0x120] sm:$0xff] (!%p237_p2)  ;;  %v2268_v21 = vpack.c.bf16 (!%p237_p2), %v305_v17, %v299_v16 }
   0xa   : > { %2263 = vmatprep.subr.bf16.mxu0 (!%p237_p2), %v2262_v9  ;;  %v317_v22 = vld [vmem:[%s4884_s1 + $0x150] sm:$0xff] (!%p237_p2)  ;;  %v324_v23 = vld [vmem:[%s4884_s1 + $0x188] sm:$0xff] (!%p237_p2)  ;;  %v330_v24 = vld [vmem:[%s4884_s1 + $0x1b8] sm:$0xff] (!%p237_p2)  ;;  %v2270_v25 = vpack.c.bf16 (!%p237_p2), %v318_v19, %v312_v18 }
   0xb   : > { %v278_v26 = vld [vmem:[%s4884_s1 + $0x18] sm:$0xff] (!%p237_p2)  ;;  %v284_v27 = vld [vmem:[%s4884_s1 + $0x48] sm:$0xff] (!%p237_p2)  ;;  %v277_v28 = vld [vmem:[%s4884_s1 + $0x10] sm:$0xff] (!%p237_p2)  ;;  %v2272_v38 = vpack.c.bf16 (!%p237_p2), %v317_v22, %v311_v20  ;;  %v2274_v40 = vpack.c.bf16 (!%p237_p2), %v330_v24, %v324_v23 }
   0xc   : > { %v2282_v29 = vpack.c.bf16 (!%p237_p2), %v284_v27, %v278_v26  ;;  %v283_v30 = vld [vmem:[%s4884_s1 + $0x40] sm:$0xff] (!%p237_p2)  ;;  %v290_v31 = vld [vmem:[%s4884_s1 + $0x78] sm:$0xff] (!%p237_p2)  ;;  %v296_v32 = vld [vmem:[%s4884_s1 + $0xa8] sm:$0xff] (!%p237_p2) }
   0xd   : > { %2265 = vmatpush1.bf16.msra.mxu0 %v2264_v14  ;;  %v2284_v33 = vpack.c.bf16 %v283_v30, %v277_v28  ;;  %v2286_v34 = vpack.c.bf16 %v296_v32, %v290_v31  ;;  %v289_v35 = vld [vmem:[%s4884_s1 + $0x70] sm:$0xff]  ;;  %v295_v36 = vld [vmem:[%s4884_s1 + $0xa0] sm:$0xff]  ;;  %v302_v37 = vld [vmem:[%s4884_s1 + $0xd8] sm:$0xff]  ;;  %s4893_s25 = smov (!%p3034_p3, %s2167_s25), 1 }
   0xe   : > { %2267 = vmatprep.subr.bf16.mxu0 %v2266_v15  ;;  %2283 = vmatprep.subr.bf16.mxu1 %v2282_v29  ;;  %v308_v39 = vld [vmem:[%s4884_s1 + $0x108] sm:$0xff]  ;;  %v323_v41 = vld [vmem:[%s4884_s1 + $0x180] sm:$0xff]  ;;  %v329_v42 = vld [vmem:[%s4884_s1 + $0x1b0] sm:$0xff]  ;;  %v2288_v44 = vpack.c.bf16 %v295_v36, %v289_v35  ;;  %s2172_s27 = sshll.u32 %s4893_s25, 3 }
   0xf   : > { %v336_v43 = vld [vmem:[%s4884_s1 + $0x1e8] sm:$0xff]  ;;  %2285 = vmatpush1.bf16.msra.mxu1 %v2284_v33  ;;  %v342_v45 = vld [vmem:[%s4884_s1 + $0x218] sm:$0xff]  ;;  %v2290_v46 = vpack.c.bf16 %v308_v39, %v302_v37  ;;  %v301_v47 = vld [vmem:[%s4884_s1 + $0xd0] sm:$0xff]  ;;  %v2276_v51 = vpack.c.bf16 %v329_v42, %v323_v41  ;;  %s269_s16 = scalar_lea.vmem %s4883_s0, %s2172_s27  ;;  %s273_s18 = scalar_lea.vmem %s4890_s7, %s2172_s27 }
  0x10   : > { %2287 = vmatprep.subr.bf16.mxu1 %v2286_v34  ;;  %v307_v48 = vld [vmem:[%s4884_s1 + $0x100] sm:$0xff]  ;;  %v314_v49 = vld [vmem:[%s4884_s1 + $0x138] sm:$0xff]  ;;  %v320_v50 = vld [vmem:[%s4884_s1 + $0x168] sm:$0xff]  ;;  %v2278_v52 = vpack.c.bf16 %v342_v45, %v336_v43 }
  0x11   : > { %2269 = vmatpush1.bf16.msra.mxu0 %v2268_v21  ;;  %v335_v53 = vld [vmem:[%s4884_s1 + $0x1e0] sm:$0xff]  ;;  %v341_v54 = vld [vmem:[%s4884_s1 + $0x210] sm:$0xff]  ;;  %v2292_v55 = vpack.c.bf16 %v307_v48, %v301_v47  ;;  %v2294_v56 = vpack.c.bf16 %v320_v50, %v314_v49  ;;  %v326_v59 = vld [vmem:[%s4884_s1 + $0x198] sm:$0xff] }
  0x12   : > { %2271 = vmatprep.subr.bf16.mxu0 %v2270_v25  ;;  %v313_v57 = vld [vmem:[%s4884_s1 + $0x130] sm:$0xff]  ;;  %v319_v58 = vld [vmem:[%s4884_s1 + $0x160] sm:$0xff]  ;;  %v332_v60 = vld [vmem:[%s4884_s1 + $0x1c8] sm:$0xff]  ;;  %v2280_v61 = vpack.c.bf16 %v341_v54, %v335_v53 }
  0x13   : > { %2289 = vmatpush1.bf16.msra.mxu1 %v2288_v44  ;;  %v348_v62 = vld [vmem:[%s4884_s1 + $0x248] sm:$0x1]  ;;  %v2296_v63 = vpack.c.bf16 %v319_v58, %v313_v57  ;;  %v2298_v0 = vpack.c.bf16 %v332_v60, %v326_v59  ;;  %v325_v1 = vld [vmem:[%s4884_s1 + $0x190] sm:$0xff]  ;;  %v331_v2 = vld [vmem:[%s4884_s1 + $0x1c0] sm:$0xff] }
  0x14   : > { %2291 = vmatprep.subr.bf16.mxu1 %v2290_v46  ;;  %v338_v3 = vld [vmem:[%s4884_s1 + $0x1f8] sm:$0xff]  ;;  %v344_v4 = vld [vmem:[%s4884_s1 + $0x228] sm:$0xff]  ;;  %v279_v8 = vld [vmem:[%s4884_s1 + $0x20] sm:$0xff]  ;;  %v2300_v11 = vpack.c.bf16 %v331_v2, %v325_v1 }
  0x15   : > { %2273 = vmatpush1.bf16.msra.mxu0 %v2272_v38  ;;  %v280_v5 = vld [vmem:[%s4884_s1 + $0x28] sm:$0xff]  ;;  %v286_v6 = vld [vmem:[%s4884_s1 + $0x58] sm:$0xff]  ;;  %v285_v9 = vld [vmem:[%s4884_s1 + $0x50] sm:$0xff]  ;;  %v2302_v15 = vpack.c.bf16 %v344_v4, %v338_v3 }
  0x16   : > { %2275 = vmatprep.subr.bf16.mxu0 %v2274_v40  ;;  %v347_v10 = vld [vmem:[%s4884_s1 + $0x240] sm:$0x1]  ;;  %v292_v12 = vld [vmem:[%s4884_s1 + $0x88] sm:$0xff]  ;;  %v298_v13 = vld [vmem:[%s4884_s1 + $0xb8] sm:$0xff]  ;;  %v2306_v18 = vpack.c.bf16 %v286_v6, %v280_v5  ;;  %v2308_v19 = vpack.c.bf16 %v285_v9, %v279_v8 }
  0x17   : > { %2293 = vmatpush1.bf16.msra.mxu1 %v2292_v55  ;;  %v3132_v14 = vld [vmem:[%s269_s16] sm:$0xff]  ;;  %v337_v16 = vld [vmem:[%s4884_s1 + $0x1f0] sm:$0xff]  ;;  %v2310_v20 = vpack.c.bf16 %v298_v13, %v292_v12  ;;  %v304_v24 = vld [vmem:[%s4884_s1 + $0xe8] sm:$0xff] }
  0x18   : > { %2295 = vmatprep.subr.bf16.mxu1 %v2294_v56  ;;  %v343_v17 = vld [vmem:[%s4884_s1 + $0x220] sm:$0xff]  ;;  %v297_v22 = vld [vmem:[%s4884_s1 + $0xb0] sm:$0xff]  ;;  %v310_v25 = vld [vmem:[%s4884_s1 + $0x118] sm:$0xff] }
  0x19   : > { %2277 = vmatpush1.bf16.msra.mxu0 %v2276_v51  ;;  %v291_v21 = vld [vmem:[%s4884_s1 + $0x80] sm:$0xff]  ;;  %v2304_v23 = vpack.c.bf16 %v343_v17, %v337_v16  ;;  %v350_v26 = vld [vmem:[%s4884_s1 + $0x258] sm:$0x1]  ;;  %v309_v29 = vld [vmem:[%s4884_s1 + $0x110] sm:$0xff]  ;;  %v2314_v32 = vpack.c.bf16 %v310_v25, %v304_v24 }
  0x1a   : > { %2279 = vmatprep.subr.bf16.mxu0 %v2278_v52  ;;  %v303_v27 = vld [vmem:[%s4884_s1 + $0xe0] sm:$0xff]  ;;  %v2312_v28 = vpack.c.bf16 %v297_v22, %v291_v21  ;;  %v596_v30 = vld [vmem:[%s4885_s2 + $0x8] sm:$0xff]  ;;  %v322_v36 = vld [vmem:[%s4884_s1 + $0x178] sm:$0xff] }
  0x1b   : > { %2297 = vmatpush1.bf16.msra.mxu1 %v2296_v63  ;;  %v600_v31 = vld [vmem:[%s4885_s2 + $0x28] sm:$0xff]  ;;  %v595_v34 = vld [vmem:[%s4885_s2] sm:$0xff]  ;;  %v349_v39 = vld [vmem:[%s4884_s1 + $0x250] sm:$0x1]  ;;  %v2316_v41 = vpack.c.bf16 %v309_v29, %v303_v27 }
  0x1c   : > { %2299 = vmatprep.subr.bf16.mxu1 %v2298_v0  ;;  %v316_v33 = vld [vmem:[%s4884_s1 + $0x148] sm:$0xff]  ;;  %v599_v35 = vld [vmem:[%s4885_s2 + $0x20] sm:$0xff]  ;;  %v2330_v40 = vpack.c.bf16 %v600_v31, %v596_v30  ;;  %v321_v43 = vld [vmem:[%s4884_s1 + $0x170] sm:$0xff] }
  0x1d   : > { %2281 = vmatpush1.bf16.msra.mxu0 %v2280_v61  ;;  %v604_v37 = vld [vmem:[%s4885_s2 + $0x48] sm:$0xff]  ;;  %v315_v42 = vld [vmem:[%s4884_s1 + $0x140] sm:$0xff]  ;;  %v2332_v44 = vpack.c.bf16 %v599_v35, %v595_v34  ;;  %v2318_v45 = vpack.c.bf16 %v322_v36, %v316_v33  ;;  %v334_v50 = vld [vmem:[%s4884_s1 + $0x1d8] sm:$0xff] }
  0x1e   : > { %2174 = vmatprep.subr.msk.mxu0 %vm357_vm0, %v348_v62  ;;  %v608_v38 = vld [vmem:[%s4885_s2 + $0x68] sm:$0xff]  ;;  %v603_v48 = vld [vmem:[%s4885_s2 + $0x40] sm:$0xff]  ;;  %v2320_v53 = vpack.c.bf16 %v321_v43, %v315_v42  ;;  %v333_v55 = vld [vmem:[%s4884_s1 + $0x1d0] sm:$0xff] }
  0x1f   : > { %2301 = vmatpush1.bf16.msra.mxu1 %v2300_v11  ;;  %v328_v46 = vld [vmem:[%s4884_s1 + $0x1a8] sm:$0xff]  ;;  %v2334_v47 = vpack.c.bf16 %v608_v38, %v604_v37  ;;  %v607_v49 = vld [vmem:[%s4885_s2 + $0x60] sm:$0xff]  ;;  %v346_v62 = vld [vmem:[%s4884_s1 + $0x238] sm:$0xff] }
  0x20   : > { %2303 = vmatprep.subr.bf16.mxu1 %v2302_v15  ;;  %v612_v51 = vld [vmem:[%s4885_s2 + $0x88] sm:$0xff]  ;;  %v327_v54 = vld [vmem:[%s4884_s1 + $0x1a0] sm:$0xff]  ;;  %v2336_v56 = vpack.c.bf16 %v607_v49, %v603_v48  ;;  %v2322_v57 = vpack.c.bf16 %v334_v50, %v328_v46  ;;  %v345_v5 = vld [vmem:[%s4884_s1 + $0x230] sm:$0xff] }
  0x21   : > { %2175 = vmatpush1.msk.msra.mxu0 %vm357_vm0, %v347_v10  ;;  %v616_v52 = vld [vmem:[%s4885_s2 + $0xa8] sm:$0xff]  ;;  %v611_v60 = vld [vmem:[%s4885_s2 + $0x80] sm:$0xff]  ;;  %v2324_v1 = vpack.c.bf16 %v333_v55, %v327_v54  ;;  %v597_v21 = vld [vmem:[%s4885_s2 + $0x10] sm:$0xff] }
  0x22   : > { %2176 = vmatmul.mubr.msk.f32.vlgmr.msra.gmra.mrb[0].mxu0 %vm353_vm1, %v3132_v14  ;;  %2307 = vmatprep.subr.bf16.mxu0 %v2306_v18  ;;  %v340_v58 = vld [vmem:[%s4884_s1 + $0x208] sm:$0xff]  ;;  %v2338_v59 = vpack.c.bf16 %v616_v52, %v612_v51  ;;  %v615_v61 = vld [vmem:[%s4885_s2 + $0xa0] sm:$0xff]  ;;  %v601_v22 = vld [vmem:[%s4885_s2 + $0x30] sm:$0xff] }
  0x23   : > { %2309 = vmatpush1.bf16.msra.mxu0 %v2308_v19  ;;  %582 = vmatprep.mubr.f32.mxu0 %v2898_v7  ;;  %v620_v63 = vld [vmem:[%s4885_s2 + $0xc8] sm:$0xff]  ;;  %v339_v2 = vld [vmem:[%s4884_s1 + $0x200] sm:$0xff]  ;;  %v2340_v3 = vpack.c.bf16 %v615_v61, %v611_v60  ;;  %v2326_v4 = vpack.c.bf16 %v346_v62, %v340_v58  ;;  %v598_v19 = vld [vmem:[%s4885_s2 + $0x18] sm:$0xff] }
  0x24   : > { %2311 = vmatprep.subr.bf16.mxu0 %v2310_v20  ;;  %2305 = vmatpush1.bf16.msra.mxu1 %v2304_v23  ;;  %v624_v0 = vld [vmem:[%s4885_s2 + $0xe8] sm:$0xff]  ;;  %v619_v8 = vld [vmem:[%s4885_s2 + $0xc0] sm:$0xff]  ;;  %v2328_v12 = vpack.c.bf16 %v345_v5, %v339_v2  ;;  %v602_v20 = vld [vmem:[%s4885_s2 + $0x38] sm:$0xff] }
  0x25   : > { %2177 = vmatprep.subr.msk.mxu1 %vm357_vm0, %v350_v26  ;;  %v2342_v6 = vpack.c.bf16 %v624_v0, %v620_v63  ;;  %v623_v9 = vld [vmem:[%s4885_s2 + $0xe0] sm:$0xff]  ;;  %v628_v10 = vld [vmem:[%s4885_s2 + $0x108] sm:$0xff]  ;;  %v606_v25 = vld [vmem:[%s4885_s2 + $0x58] sm:$0xff]  ;;  %v2498_v29 = vpack.c.bf16 %v602_v20, %v598_v19 }
  0x26   : > { %v632_v11 = vld [vmem:[%s4885_s2 + $0x128] sm:$0xff]  ;;  %v2344_v13 = vpack.c.bf16 %v623_v9, %v619_v8  ;;  %v627_v17 = vld [vmem:[%s4885_s2 + $0x100] sm:$0xff]  ;;  %v610_v26 = vld [vmem:[%s4885_s2 + $0x78] sm:$0xff] }
  0x27   : > { %2313 = vmatpush1.bf16.msra.mxu0 %v2312_v28  ;;  %v352_v15 = vld [vmem:[%s4884_s1 + $0x268] sm:$0x1]  ;;  %v2346_v16 = vpack.c.bf16 %v632_v11, %v628_v10  ;;  %v631_v18 = vld [vmem:[%s4885_s2 + $0x120] sm:$0xff]  ;;  %v2502_v36 = vpack.c.bf16 %v610_v26, %v606_v25  ;;  %v605_v37 = vld [vmem:[%s4885_s2 + $0x50] sm:$0xff] }
  0x28   : > { %2315 = vmatprep.subr.bf16.mxu0 %v2314_v32  ;;  %2178 = vmatpush1.msk.msra.mxu1 %vm357_vm0, %v349_v39  ;;  %v636_v23 = vld [vmem:[%s4885_s2 + $0x148] sm:$0xff]  ;;  %v2348_v27 = vpack.c.bf16 %v631_v18, %v627_v17  ;;  %v351_v28 = vld [vmem:[%s4884_s1 + $0x260] sm:$0x1]  ;;  %v2500_v32 = vpack.c.bf16 %v601_v22, %v597_v21  ;;  %v609_v38 = vld [vmem:[%s4885_s2 + $0x70] sm:$0xff] }
  0x29   : > { %2179 = vmatmul.mubr.msk.f32.vlgmr.msra.gmra.mrb[0].mxu1 %vm353_vm1, %v3132_v14  ;;  %2331 = vmatprep.subr.bf16.mxu1 %v2330_v40  ;;  %v640_v24 = vld [vmem:[%s4885_s2 + $0x168] sm:$0xff]  ;;  %v635_v30 = vld [vmem:[%s4885_s2 + $0x140] sm:$0xff]  ;;  %v614_v39 = vld [vmem:[%s4885_s2 + $0x98] sm:$0xff] }
  0x2a   : > { %2333 = vmatpush1.bf16.msra.mxu1 %v2332_v44  ;;  %v639_v31 = vld [vmem:[%s4885_s2 + $0x160] sm:$0xff]  ;;  %v2350_v33 = vpack.c.bf16 %v640_v24, %v636_v23  ;;  %v644_v34 = vld [vmem:[%s4885_s2 + $0x188] sm:$0xff]  ;;  %v618_v40 = vld [vmem:[%s4885_s2 + $0xb8] sm:$0xff] }
  0x2b   : > { %2317 = vmatpush1.bf16.msra.mxu0 %v2316_v41  ;;  %2335 = vmatprep.subr.bf16.mxu1 %v2334_v47  ;;  %v648_v35 = vld [vmem:[%s4885_s2 + $0x1a8] sm:$0xff]  ;;  %v2352_v41 = vpack.c.bf16 %v639_v31, %v635_v30  ;;  %v643_v43 = vld [vmem:[%s4885_s2 + $0x180] sm:$0xff]  ;;  %v2506_v47 = vpack.c.bf16 %v618_v40, %v614_v39  ;;  %v613_v48 = vld [vmem:[%s4885_s2 + $0x90] sm:$0xff] }
  0x2c   : > { %2319 = vmatprep.subr.bf16.mxu0 %v2318_v45  ;;  %v2354_v42 = vpack.c.bf16 %v648_v35, %v644_v34  ;;  %v647_v44 = vld [vmem:[%s4885_s2 + $0x1a0] sm:$0xff]  ;;  %v2504_v45 = vpack.c.bf16 %v609_v38, %v605_v37  ;;  %v652_v46 = vld [vmem:[%s4885_s2 + $0x1c8] sm:$0xff]  ;;  %v617_v49 = vld [vmem:[%s4885_s2 + $0xb0] sm:$0xff] }
  0x2d   : > { %v622_v50 = vld [vmem:[%s4885_s2 + $0xd8] sm:$0xff]  ;;  %v2356_v52 = vpack.c.bf16 %v647_v44, %v643_v43  ;;  %v651_v54 = vld [vmem:[%s4885_s2 + $0x1c0] sm:$0xff]  ;;  %v664_v58 = vld [vmem:[%s4885_s2 + $0x228] sm:$0xff] }
  0x2e   : > { %2337 = vmatpush1.bf16.msra.mxu1 %v2336_v56  ;;  %v626_v51 = vld [vmem:[%s4885_s2 + $0xf8] sm:$0xff]  ;;  %v655_v55 = vld [vmem:[%s4885_s2 + $0x1e0] sm:$0xff]  ;;  %v2508_v56 = vpack.c.bf16 %v617_v49, %v613_v48  ;;  %v621_v60 = vld [vmem:[%s4885_s2 + $0xd0] sm:$0xff] }
  0x2f   : > { %2321 = vmatpush1.bf16.msra.mxu0 %v2320_v53  ;;  %2339 = vmatprep.subr.bf16.mxu1 %v2338_v59  ;;  %v2510_v59 = vpack.c.bf16 %v626_v51, %v622_v50  ;;  %v625_v61 = vld [vmem:[%s4885_s2 + $0xf0] sm:$0xff]  ;;  %v630_v62 = vld [vmem:[%s4885_s2 + $0x118] sm:$0xff]  ;;  %v2360_v0 = vpack.c.bf16 %v655_v55, %v651_v54  ;;  %v659_v2 = vld [vmem:[%s4885_s2 + $0x200] sm:$0xff] }
  0x30   : > { %2323 = vmatprep.subr.bf16.mxu0 %v2322_v57  ;;  %v660_v57 = vld [vmem:[%s4885_s2 + $0x208] sm:$0xff]  ;;  %v634_v63 = vld [vmem:[%s4885_s2 + $0x138] sm:$0xff]  ;;  %v629_v9 = vld [vmem:[%s4885_s2 + $0x110] sm:$0xff] }
  0x31   : > { %v668_v5 = vld [vmem:[%s4885_s2 + $0x248] sm:$0xff]  ;;  %v2514_v8 = vpack.c.bf16 %v634_v63, %v630_v62  ;;  %v633_v10 = vld [vmem:[%s4885_s2 + $0x130] sm:$0xff]  ;;  %v638_v11 = vld [vmem:[%s4885_s2 + $0x158] sm:$0xff] }
  0x32   : > { %2341 = vmatpush1.bf16.msra.mxu1 %v2340_v3  ;;  %v663_v3 = vld [vmem:[%s4885_s2 + $0x220] sm:$0xff]  ;;  %v2516_v18 = vpack.c.bf16 %v633_v10, %v629_v9  ;;  %v676_v19 = vld [vmem:[%s4885_s2 + $0x288] sm:$0xff]  ;;  %v637_v22 = vld [vmem:[%s4885_s2 + $0x150] sm:$0xff] }
  0x33   : > { %2325 = vmatpush1.bf16.msra.mxu0 %v2324_v1  ;;  %2343 = vmatprep.subr.bf16.mxu1 %v2342_v6  ;;  %v2362_v1 = vpack.c.bf16 %v664_v58, %v660_v57  ;;  %v672_v6 = vld [vmem:[%s4885_s2 + $0x268] sm:$0xff]  ;;  %v671_v17 = vld [vmem:[%s4885_s2 + $0x260] sm:$0xff]  ;;  %v641_v23 = vld [vmem:[%s4885_s2 + $0x170] sm:$0xff] }
  0x34   : > { %2327 = vmatprep.subr.bf16.mxu0 %v2326_v4  ;;  %v2512_v4 = vpack.c.bf16 %v625_v61, %v621_v60  ;;  %v680_v20 = vld [vmem:[%s4885_s2 + $0x2a8] sm:$0xff]  ;;  %v646_v24 = vld [vmem:[%s4885_s2 + $0x198] sm:$0xff]  ;;  %v2520_v30 = vpack.c.bf16 %v641_v23, %v637_v22  ;;  %v645_v34 = vld [vmem:[%s4885_s2 + $0x190] sm:$0xff] }
  0x35   : > { %v650_v25 = vld [vmem:[%s4885_s2 + $0x1b8] sm:$0xff]  ;;  %v684_v31 = vld [vmem:[%s4885_s2 + $0x2c8] sm:$0xff]  ;;  %v649_v35 = vld [vmem:[%s4885_s2 + $0x1b0] sm:$0xff] }
  0x36   : > { %2345 = vmatpush1.bf16.msra.mxu1 %v2344_v13  ;;  %v2364_v13 = vpack.c.bf16 %v663_v3, %v659_v2  ;;  %v658_v37 = vld [vmem:[%s4885_s2 + $0x1f8] sm:$0xff]  ;;  %v683_v40 = vld [vmem:[%s4885_s2 + $0x2c0] sm:$0xff]  ;;  %v692_v43 = vld [vmem:[%s4885_s2 + $0x308] sm:$0xff] }
  0x37   : > { %2329 = vmatpush1.bf16.msra.mxu0 %v2328_v12  ;;  %2347 = vmatprep.subr.bf16.mxu1 %v2346_v16  ;;  %v642_v12 = vld [vmem:[%s4885_s2 + $0x178] sm:$0xff]  ;;  %v667_v16 = vld [vmem:[%s4885_s2 + $0x240] sm:$0xff]  ;;  %v696_v44 = vld [vmem:[%s4885_s2 + $0x328] sm:$0xff] }
  0x38   : > { %2180 = vmatprep.subr.msk.mxu0 %vm357_vm0, %v352_v15  ;;  %v2366_v15 = vpack.c.bf16 %v672_v6, %v668_v5  ;;  %v2518_v21 = vpack.c.bf16 %v642_v12, %v638_v11  ;;  %v2368_v26 = vpack.c.bf16 %v671_v17, %v667_v16  ;;  %v666_v48 = vld [vmem:[%s4885_s2 + $0x238] sm:$0xff]  ;;  %v2378_v50 = vpack.c.bf16 %v696_v44, %v692_v43  ;;  %v691_v51 = vld [vmem:[%s4885_s2 + $0x300] sm:$0xff]  ;;  %v700_v54 = vld [vmem:[%s4885_s2 + $0x348] sm:$0xff] }
  0x39   : > { %v704_v55 = vld [vmem:[%s4885_s2 + $0x368] sm:$0xff]  ;;  %v661_v57 = vld [vmem:[%s4885_s2 + $0x210] sm:$0xff]  ;;  %v674_v60 = vld [vmem:[%s4885_s2 + $0x278] sm:$0xff] }
  0x3a   : > { %2349 = vmatpush1.bf16.msra.mxu1 %v2348_v27  ;;  %v2370_v27 = vpack.c.bf16 %v680_v20, %v676_v19  ;;  %v665_v58 = vld [vmem:[%s4885_s2 + $0x230] sm:$0xff]  ;;  %v2382_v62 = vpack.c.bf16 %v704_v55, %v700_v54  ;;  %v699_v63 = vld [vmem:[%s4885_s2 + $0x340] sm:$0xff]  ;;  %v708_v2 = vld [vmem:[%s4885_s2 + $0x388] sm:$0xff] }
  0x3b   : > { %2181 = vmatpush1.msk.msra.mxu0 %vm357_vm0, %v351_v28  ;;  %2351 = vmatprep.subr.bf16.mxu1 %v2350_v33  ;;  %v675_v28 = vld [vmem:[%s4885_s2 + $0x280] sm:$0xff]  ;;  %v2522_v33 = vpack.c.bf16 %v650_v25, %v646_v24  ;;  %v712_v3 = vld [vmem:[%s4885_s2 + $0x3a8] sm:$0xff]  ;;  %v669_v5 = vld [vmem:[%s4885_s2 + $0x250] sm:$0xff] }
  0x3c   : > { %2182 = vmatmul.mubr.msk.f32.vlgmr.msra.gmra.mrb[2].mxu0 %vm353_vm1, %v3132_v14  ;;  %2499 = vmatprep.subr.bf16.mxu0 %v2498_v29  ;;  %v656_v14 = vld [vmem:[%s4885_s2 + $0x1e8] sm:$0xff]  ;;  %v679_v29 = vld [vmem:[%s4885_s2 + $0x2a0] sm:$0xff]  ;;  %v673_v6 = vld [vmem:[%s4885_s2 + $0x270] sm:$0xff]  ;;  %v2386_v11 = vpack.c.bf16 %v712_v3, %v708_v2 }
  0x3d   : > { %2501 = vmatpush1.bf16.msra.mxu0 %v2500_v32  ;;  %v2358_v53 = vpack.c.bf16 %v656_v14, %v652_v46  ;;  %v688_v32 = vld [vmem:[%s4885_s2 + $0x2e8] sm:$0xff]  ;;  %v2372_v38 = vpack.c.bf16 %v679_v29, %v675_v28  ;;  %v653_v46 = vld [vmem:[%s4885_s2 + $0x1d0] sm:$0xff]  ;;  %v682_v9 = vld [vmem:[%s4885_s2 + $0x2b8] sm:$0xff] }
  0x3e   : > { %2503 = vmatprep.subr.bf16.mxu0 %v2502_v36  ;;  %2353 = vmatpush1.bf16.msra.mxu1 %v2352_v41  ;;  %v654_v36 = vld [vmem:[%s4885_s2 + $0x1d8] sm:$0xff]  ;;  %v2374_v39 = vpack.c.bf16 %v688_v32, %v684_v31  ;;  %v687_v41 = vld [vmem:[%s4885_s2 + $0x2e0] sm:$0xff]  ;;  %v657_v14 = vld [vmem:[%s4885_s2 + $0x1f0] sm:$0xff] }
  0x3f   : > { %2355 = vmatprep.subr.bf16.mxu1 %v2354_v42  ;;  %v2524_v42 = vpack.c.bf16 %v649_v35, %v645_v34  ;;  %v2376_v49 = vpack.c.bf16 %v687_v41, %v683_v40  ;;  %v707_v12 = vld [vmem:[%s4885_s2 + $0x380] sm:$0xff]  ;;  %v677_v17 = vld [vmem:[%s4885_s2 + $0x290] sm:$0xff]  ;;  %v686_v19 = vld [vmem:[%s4885_s2 + $0x2d8] sm:$0xff] }
  0x40   : > { %v690_v20 = vld [vmem:[%s4885_s2 + $0x2f8] sm:$0xff]  ;;  %v685_v24 = vld [vmem:[%s4885_s2 + $0x2d0] sm:$0xff]  ;;  %v732_v2 = vld [vmem:[%s4885_s2 + $0x448] sm:$0xff] }
  0x41   : > { %2505 = vmatpush1.bf16.msra.mxu0 %v2504_v45  ;;  %v2526_v45 = vpack.c.bf16 %v658_v37, %v654_v36  ;;  %v2542_v23 = vpack.c.bf16 %v690_v20, %v686_v19  ;;  %v689_v25 = vld [vmem:[%s4885_s2 + $0x2f0] sm:$0xff]  ;;  %v702_v32 = vld [vmem:[%s4885_s2 + $0x358] sm:$0xff]  ;;  %v740_v20 = vld [vmem:[%s4885_s2 + $0x488] sm:$0xff] }
  0x42   : > { %2507 = vmatprep.subr.bf16.mxu0 %v2506_v47  ;;  %2357 = vmatpush1.bf16.msra.mxu1 %v2356_v52  ;;  %v662_v47 = vld [vmem:[%s4885_s2 + $0x218] sm:$0xff]  ;;  %v695_v52 = vld [vmem:[%s4885_s2 + $0x320] sm:$0xff]  ;;  %v2544_v28 = vpack.c.bf16 %v689_v25, %v685_v24  ;;  %v697_v31 = vld [vmem:[%s4885_s2 + $0x330] sm:$0xff] }
  0x43   : > { %2359 = vmatprep.subr.bf16.mxu1 %v2358_v53  ;;  %v2528_v53 = vpack.c.bf16 %v657_v14, %v653_v46  ;;  %v2380_v61 = vpack.c.bf16 %v695_v52, %v691_v51  ;;  %v701_v36 = vld [vmem:[%s4885_s2 + $0x350] sm:$0xff]  ;;  %v720_v46 = vld [vmem:[%s4885_s2 + $0x3e8] sm:$0xff]  ;;  %v718_v14 = vld [vmem:[%s4885_s2 + $0x3d8] sm:$0xff] }
  0x44   : > { %v705_v37 = vld [vmem:[%s4885_s2 + $0x370] sm:$0xff] }
  0x45   : > { %2509 = vmatpush1.bf16.msra.mxu0 %v2508_v56  ;;  %v2530_v56 = vpack.c.bf16 %v666_v48, %v662_v47  ;;  %v2552_v40 = vpack.c.bf16 %v705_v37, %v701_v36  ;;  %v713_v43 = vld [vmem:[%s4885_s2 + $0x3b0] sm:$0xff]  ;;  %v722_v48 = vld [vmem:[%s4885_s2 + $0x3f8] sm:$0xff] }
  0x46   : > { %2511 = vmatprep.subr.bf16.mxu0 %v2510_v59  ;;  %2361 = vmatpush1.bf16.msra.mxu1 %v2360_v0  ;;  %v670_v59 = vld [vmem:[%s4885_s2 + $0x258] sm:$0xff]  ;;  %v703_v0 = vld [vmem:[%s4885_s2 + $0x360] sm:$0xff]  ;;  %v2558_v51 = vpack.c.bf16 %v722_v48, %v718_v14  ;;  %v721_v54 = vld [vmem:[%s4885_s2 + $0x3f0] sm:$0xff] }
  0x47   : > { %2363 = vmatprep.subr.bf16.mxu1 %v2362_v1  ;;  %v2532_v1 = vpack.c.bf16 %v665_v58, %v661_v57  ;;  %v2384_v10 = vpack.c.bf16 %v703_v0, %v699_v63  ;;  %v728_v57 = vld [vmem:[%s4885_s2 + $0x428] sm:$0xff]  ;;  %v726_v58 = vld [vmem:[%s4885_s2 + $0x418] sm:$0xff]  ;;  %v727_v63 = vld [vmem:[%s4885_s2 + $0x420] sm:$0xff] }
  0x48   : > { %v725_v0 = vld [vmem:[%s4885_s2 + $0x410] sm:$0xff]  ;;  %v758_v48 = vld [vmem:[%s4885_s2 + $0x518] sm:$0xff] }
  0x49   : > { %2513 = vmatpush1.bf16.msra.mxu0 %v2512_v4  ;;  %v2534_v4 = vpack.c.bf16 %v674_v60, %v670_v59  ;;  %v730_v60 = vld [vmem:[%s4885_s2 + $0x438] sm:$0xff]  ;;  %v737_v19 = vld [vmem:[%s4885_s2 + $0x470] sm:$0xff] }
  0x4a   : > { %2515 = vmatprep.subr.bf16.mxu0 %v2514_v8  ;;  %2365 = vmatpush1.bf16.msra.mxu1 %v2364_v13  ;;  %v678_v8 = vld [vmem:[%s4885_s2 + $0x298] sm:$0xff]  ;;  %v711_v13 = vld [vmem:[%s4885_s2 + $0x3a0] sm:$0xff] }
  0x4b   : > { %2367 = vmatprep.subr.bf16.mxu1 %v2366_v15  ;;  %v2536_v15 = vpack.c.bf16 %v673_v6, %v669_v5  ;;  %v2538_v16 = vpack.c.bf16 %v682_v9, %v678_v8  ;;  %v734_v5 = vld [vmem:[%s4885_s2 + $0x458] sm:$0xff] }
  0x4c   : > { %v738_v6 = vld [vmem:[%s4885_s2 + $0x478] sm:$0xff] }
  0x4d   : > { %2517 = vmatpush1.bf16.msra.mxu0 %v2516_v18  ;;  %v681_v18 = vld [vmem:[%s4885_s2 + $0x2b0] sm:$0xff] }
  0x4e   : > { %2519 = vmatprep.subr.bf16.mxu0 %v2518_v21  ;;  %2369 = vmatpush1.bf16.msra.mxu1 %v2368_v26  ;;  %v2388_v21 = vpack.c.bf16 %v711_v13, %v707_v12  ;;  %v2540_v22 = vpack.c.bf16 %v681_v18, %v677_v17  ;;  %v694_v26 = vld [vmem:[%s4885_s2 + $0x318] sm:$0xff]  ;;  %v731_v12 = vld [vmem:[%s4885_s2 + $0x440] sm:$0xff]  ;;  %v2566_v17 = vpack.c.bf16 %v738_v6, %v734_v5  ;;  %v733_v18 = vld [vmem:[%s4885_s2 + $0x450] sm:$0xff] }
  0x4f   : > { %2371 = vmatprep.subr.bf16.mxu1 %v2370_v27  ;;  %v698_v27 = vld [vmem:[%s4885_s2 + $0x338] sm:$0xff]  ;;  %v735_v13 = vld [vmem:[%s4885_s2 + $0x460] sm:$0xff]  ;;  %v2568_v25 = vpack.c.bf16 %v737_v19, %v733_v18  ;;  %v769_v5 = vld [vmem:[%s4885_s2 + $0x570] sm:$0xff] }
  0x50   : > { %v2546_v29 = vpack.c.bf16 %v698_v27, %v694_v26  ;;  %v2400_v24 = vpack.c.bf16 %v735_v13, %v731_v12  ;;  %v739_v26 = vld [vmem:[%s4885_s2 + $0x480] sm:$0xff]  ;;  %v772_v6 = vld [vmem:[%s4885_s2 + $0x588] sm:$0xff]  ;;  %v773_v18 = vld [vmem:[%s4885_s2 + $0x590] sm:$0xff] }
  0x51   : > { %2521 = vmatpush1.bf16.msra.mxu0 %v2520_v30  ;;  %v693_v30 = vld [vmem:[%s4885_s2 + $0x310] sm:$0xff]  ;;  %v743_v27 = vld [vmem:[%s4885_s2 + $0x4a0] sm:$0xff] }
  0x52   : > { %2523 = vmatprep.subr.bf16.mxu0 %v2522_v33  ;;  %2373 = vmatpush1.bf16.msra.mxu1 %v2372_v38  ;;  %v706_v33 = vld [vmem:[%s4885_s2 + $0x378] sm:$0xff]  ;;  %v2548_v34 = vpack.c.bf16 %v697_v31, %v693_v30  ;;  %v741_v30 = vld [vmem:[%s4885_s2 + $0x490] sm:$0xff]  ;;  %v2404_v37 = vpack.c.bf16 %v743_v27, %v739_v26  ;;  %v771_v13 = vld [vmem:[%s4885_s2 + $0x580] sm:$0xff] }
  0x53   : > { %2375 = vmatprep.subr.bf16.mxu1 %v2374_v39  ;;  %v2550_v35 = vpack.c.bf16 %v706_v33, %v702_v32  ;;  %v710_v38 = vld [vmem:[%s4885_s2 + $0x398] sm:$0xff]  ;;  %v745_v31 = vld [vmem:[%s4885_s2 + $0x4b0] sm:$0xff]  ;;  %v748_v32 = vld [vmem:[%s4885_s2 + $0x4c8] sm:$0xff] }
  0x54   : > { %v714_v39 = vld [vmem:[%s4885_s2 + $0x3b8] sm:$0xff]  ;;  %v752_v33 = vld [vmem:[%s4885_s2 + $0x4e8] sm:$0xff]  ;;  %v777_v19 = vld [vmem:[%s4885_s2 + $0x5b0] sm:$0xff] }
  0x55   : > { %2525 = vmatpush1.bf16.msra.mxu0 %v2524_v42  ;;  %v2554_v41 = vpack.c.bf16 %v714_v39, %v710_v38  ;;  %v709_v42 = vld [vmem:[%s4885_s2 + $0x390] sm:$0xff]  ;;  %v2572_v38 = vpack.c.bf16 %v745_v31, %v741_v30  ;;  %v747_v39 = vld [vmem:[%s4885_s2 + $0x4c0] sm:$0xff] }
  0x56   : > { %2527 = vmatprep.subr.bf16.mxu0 %v2526_v45  ;;  %2377 = vmatpush1.bf16.msra.mxu1 %v2376_v49  ;;  %v2556_v44 = vpack.c.bf16 %v713_v43, %v709_v42  ;;  %v716_v45 = vld [vmem:[%s4885_s2 + $0x3c8] sm:$0xff]  ;;  %v715_v49 = vld [vmem:[%s4885_s2 + $0x3c0] sm:$0xff]  ;;  %v2406_v42 = vpack.c.bf16 %v752_v33, %v748_v32  ;;  %v781_v30 = vld [vmem:[%s4885_s2 + $0x5d0] sm:$0xff] }
  0x57   : > { %2379 = vmatprep.subr.bf16.mxu1 %v2378_v50  ;;  %v2390_v47 = vpack.c.bf16 %v720_v46, %v716_v45  ;;  %v719_v50 = vld [vmem:[%s4885_s2 + $0x3e0] sm:$0xff]  ;;  %v753_v45 = vld [vmem:[%s4885_s2 + $0x4f0] sm:$0xff]  ;;  %v756_v46 = vld [vmem:[%s4885_s2 + $0x508] sm:$0xff] }
  0x58   : > { %v2392_v52 = vpack.c.bf16 %v719_v50, %v715_v49  ;;  %v762_v49 = vld [vmem:[%s4885_s2 + $0x538] sm:$0xff]  ;;  %v779_v26 = vld [vmem:[%s4885_s2 + $0x5c0] sm:$0xff]  ;;  %v785_v31 = vld [vmem:[%s4885_s2 + $0x5f0] sm:$0xff] }
  0x59   : > { %2529 = vmatpush1.bf16.msra.mxu0 %v2528_v53  ;;  %v717_v53 = vld [vmem:[%s4885_s2 + $0x3d0] sm:$0xff]  ;;  %v783_v27 = vld [vmem:[%s4885_s2 + $0x5e0] sm:$0xff]  ;;  %v788_v32 = vld [vmem:[%s4885_s2 + $0x608] sm:$0xff] }
  0x5a   : > { %2531 = vmatprep.subr.bf16.mxu0 %v2530_v56  ;;  %2381 = vmatpush1.bf16.msra.mxu1 %v2380_v61  ;;  %v2560_v55 = vpack.c.bf16 %v721_v54, %v717_v53  ;;  %v724_v56 = vld [vmem:[%s4885_s2 + $0x408] sm:$0xff]  ;;  %v2562_v61 = vpack.c.bf16 %v730_v60, %v726_v58  ;;  %v759_v53 = vld [vmem:[%s4885_s2 + $0x520] sm:$0xff]  ;;  %v766_v60 = vld [vmem:[%s4885_s2 + $0x558] sm:$0xff] }
  0x5b   : > { %2383 = vmatprep.subr.bf16.mxu1 %v2382_v62  ;;  %v2394_v59 = vpack.c.bf16 %v728_v57, %v724_v56  ;;  %v723_v62 = vld [vmem:[%s4885_s2 + $0x400] sm:$0xff]  ;;  %v757_v56 = vld [vmem:[%s4885_s2 + $0x510] sm:$0xff]  ;;  %v764_v58 = vld [vmem:[%s4885_s2 + $0x548] sm:$0xff] }
  0x5c   : > { %v761_v57 = vld [vmem:[%s4885_s2 + $0x530] sm:$0xff] }
  0x5d   : > { %2533 = vmatpush1.bf16.msra.mxu0 %v2532_v1  ;;  %v729_v1 = vld [vmem:[%s4885_s2 + $0x430] sm:$0xff] }
  0x5e   : > { %2535 = vmatprep.subr.bf16.mxu0 %v2534_v4  ;;  %2385 = vmatpush1.bf16.msra.mxu1 %v2384_v10  ;;  %v736_v4 = vld [vmem:[%s4885_s2 + $0x468] sm:$0xff]  ;;  %v2396_v10 = vpack.c.bf16 %v727_v63, %v723_v62  ;;  %v2580_v63 = vpack.c.bf16 %v761_v57, %v757_v56  ;;  %v797_v56 = vld [vmem:[%s4885_s2 + $0x650] sm:$0xff] }
  0x5f   : > { %2387 = vmatprep.subr.bf16.mxu1 %v2386_v11  ;;  %v2564_v11 = vpack.c.bf16 %v729_v1, %v725_v0  ;;  %v763_v0 = vld [vmem:[%s4885_s2 + $0x540] sm:$0xff]  ;;  %v801_v57 = vld [vmem:[%s4885_s2 + $0x670] sm:$0xff] }
  0x60   : > { %v767_v1 = vld [vmem:[%s4885_s2 + $0x560] sm:$0xff] }
  0x61   : > { %2537 = vmatpush1.bf16.msra.mxu0 %v2536_v15 }
  0x62   : > { %2539 = vmatprep.subr.bf16.mxu0 %v2538_v16  ;;  %2389 = vmatpush1.bf16.msra.mxu1 %v2388_v21  ;;  %v2398_v16 = vpack.c.bf16 %v736_v4, %v732_v2  ;;  %v744_v21 = vld [vmem:[%s4885_s2 + $0x4a8] sm:$0xff]  ;;  %v765_v4 = vld [vmem:[%s4885_s2 + $0x550] sm:$0xff] }
  0x63   : > { %2391 = vmatprep.subr.bf16.mxu1 %v2390_v47  ;;  %v760_v47 = vld [vmem:[%s4885_s2 + $0x528] sm:$0xff]  ;;  %v2584_v12 = vpack.c.bf16 %v769_v5, %v765_v4  ;;  %v805_v4 = vld [vmem:[%s4885_s2 + $0x690] sm:$0xff] }
  0x64   : > { %v2410_v54 = vpack.c.bf16 %v760_v47, %v756_v46  ;;  %v793_v46 = vld [vmem:[%s4885_s2 + $0x630] sm:$0xff]  ;;  %v800_v47 = vld [vmem:[%s4885_s2 + $0x668] sm:$0xff] }
  0x65   : > { %2541 = vmatpush1.bf16.msra.mxu0 %v2540_v22  ;;  %v742_v22 = vld [vmem:[%s4885_s2 + $0x498] sm:$0xff]  ;;  %v809_v5 = vld [vmem:[%s4885_s2 + $0x6b0] sm:$0xff] }
  0x66   : > { %2543 = vmatprep.subr.bf16.mxu0 %v2542_v23  ;;  %2393 = vmatpush1.bf16.msra.mxu1 %v2392_v52  ;;  %v746_v23 = vld [vmem:[%s4885_s2 + $0x4b8] sm:$0xff]  ;;  %v755_v52 = vld [vmem:[%s4885_s2 + $0x500] sm:$0xff] }
  0x67   : > { %2395 = vmatprep.subr.bf16.mxu1 %v2394_v59  ;;  %v768_v59 = vld [vmem:[%s4885_s2 + $0x568] sm:$0xff]  ;;  %v2412_v62 = vpack.c.bf16 %v759_v53, %v755_v52  ;;  %v795_v52 = vld [vmem:[%s4885_s2 + $0x640] sm:$0xff] }
  0x68   : > { %v2414_v2 = vpack.c.bf16 %v768_v59, %v764_v58  ;;  %v799_v53 = vld [vmem:[%s4885_s2 + $0x660] sm:$0xff]  ;;  %v804_v58 = vld [vmem:[%s4885_s2 + $0x688] sm:$0xff] }
  0x69   : > { %2545 = vmatpush1.bf16.msra.mxu0 %v2544_v28  ;;  %v2402_v28 = vpack.c.bf16 %v744_v21, %v740_v20  ;;  %v780_v20 = vld [vmem:[%s4885_s2 + $0x5c8] sm:$0xff] }
  0x6a   : > { %2547 = vmatprep.subr.bf16.mxu0 %v2546_v29  ;;  %v2570_v29 = vpack.c.bf16 %v746_v23, %v742_v22  ;;  %v784_v21 = vld [vmem:[%s4885_s2 + $0x5e8] sm:$0xff]  ;;  %v782_v22 = vld [vmem:[%s4885_s2 + $0x5d8] sm:$0xff] }
  0x6b   : > { %v786_v23 = vld [vmem:[%s4885_s2 + $0x5f8] sm:$0xff]  ;;  %v808_v59 = vld [vmem:[%s4885_s2 + $0x6a8] sm:$0xff] }
  0x6d   : > { %2549 = vmatpush1.bf16.msra.mxu0 %v2548_v34  ;;  %v750_v34 = vld [vmem:[%s4885_s2 + $0x4d8] sm:$0xff] }
  0x6e   : > { %2551 = vmatprep.subr.bf16.mxu0 %v2550_v35  ;;  %v754_v35 = vld [vmem:[%s4885_s2 + $0x4f8] sm:$0xff] }
  0x6f   : > { %v2574_v43 = vpack.c.bf16 %v754_v35, %v750_v34  ;;  %v792_v34 = vld [vmem:[%s4885_s2 + $0x628] sm:$0xff]  ;;  %v790_v35 = vld [vmem:[%s4885_s2 + $0x618] sm:$0xff] }
  0x71   : > { %2553 = vmatpush1.bf16.msra.mxu0 %v2552_v40  ;;  %v751_v40 = vld [vmem:[%s4885_s2 + $0x4e0] sm:$0xff] }
  0x72   : > { %2555 = vmatprep.subr.bf16.mxu0 %v2554_v41  ;;  %v2408_v50 = vpack.c.bf16 %v751_v40, %v747_v39  ;;  %v2424_v39 = vpack.c.bf16 %v783_v27, %v779_v26  ;;  %v2592_v40 = vpack.c.bf16 %v785_v31, %v781_v30  ;;  %v819_v26 = vld [vmem:[%s4885_s2 + $0x700] sm:$0xff]  ;;  %v821_v30 = vld [vmem:[%s4885_s2 + $0x710] sm:$0xff] }
  0x73   : > { %v823_v27 = vld [vmem:[%s4885_s2 + $0x720] sm:$0xff]  ;;  %v825_v31 = vld [vmem:[%s4885_s2 + $0x730] sm:$0xff] }
  0x75   : > { %2557 = vmatpush1.bf16.msra.mxu0 %v2556_v44  ;;  %v749_v44 = vld [vmem:[%s4885_s2 + $0x4d0] sm:$0xff] }
  0x76   : > { %2559 = vmatprep.subr.bf16.mxu0 %v2558_v51  ;;  %v2576_v51 = vpack.c.bf16 %v753_v45, %v749_v44  ;;  %v789_v45 = vld [vmem:[%s4885_s2 + $0x610] sm:$0xff] }
  0x79   : > { %2561 = vmatpush1.bf16.msra.mxu0 %v2560_v55  ;;  %v2578_v55 = vpack.c.bf16 %v762_v49, %v758_v48  ;;  %v798_v48 = vld [vmem:[%s4885_s2 + $0x658] sm:$0xff] }
  0x7a   : > { %2563 = vmatprep.subr.bf16.mxu0 %v2562_v61  ;;  %v770_v61 = vld [vmem:[%s4885_s2 + $0x578] sm:$0xff] }
  0x7b   : > { %v802_v49 = vld [vmem:[%s4885_s2 + $0x678] sm:$0xff] }
  0xf5   : > { %v442_v3 = vpop.f32.mrb[0].mxu0 }
  0xf6   : > { %v444_v8 = vpop.f32.mrb[1].mxu0  ;;  %v589_v15 = vmax.f32 %v442_v3, 0.0  ;;  %v2582_v3 = vpack.c.bf16 %v770_v61, %v766_v60  ;;  %v806_v60 = vld [vmem:[%s4885_s2 + $0x698] sm:$0xff] }
  0xf7   : > { %v590_v9 = vmax.f32 %v444_v8, 0.0  ;;  %v776_v8 = vld [vmem:[%s4885_s2 + $0x5a8] sm:$0xff]  ;;  %v810_v61 = vld [vmem:[%s4885_s2 + $0x6b8] sm:$0xff] }
  0xf9   : > { %1015 = vmatprep.mubr.f32.mxu1 %v590_v9  ;;  %1228 = vmatprep.mubr.f32.mxu0 %v590_v9  ;;  %v774_v9 = vld [vmem:[%s4885_s2 + $0x598] sm:$0xff] }
  0xfa   : > { %1016 = vmatmul.mubr.f32.vlgmr.msra.gmra.mrb[2].mxu1 %v589_v15  ;;  %1229 = vmatmul.mubr.f32.vlgmr.msra.gmra.mrb[4].mxu0 %v589_v15  ;;  %v775_v15 = vld [vmem:[%s4885_s2 + $0x5a0] sm:$0xff] }
  0xfb   : > { %2397 = vmatpush1.bf16.msra.mxu1 %v2396_v10  ;;  %2565 = vmatpush1.bf16.msra.mxu0 %v2564_v11  ;;  %v778_v10 = vld [vmem:[%s4885_s2 + $0x5b8] sm:$0xff]  ;;  %v2416_v11 = vpack.c.bf16 %v767_v1, %v763_v0  ;;  %v803_v0 = vld [vmem:[%s4885_s2 + $0x680] sm:$0xff] }
  0xfc   : > { %2399 = vmatprep.subr.bf16.mxu1 %v2398_v16  ;;  %2567 = vmatprep.subr.bf16.mxu0 %v2566_v17  ;;  %v3686_v36 = vpop.f32.mrb[0].mxu1  ;;  %v2418_v16 = vpack.c.bf16 %v776_v8, %v772_v6  ;;  %v2586_v17 = vpack.c.bf16 %v778_v10, %v774_v9  ;;  %v807_v1 = vld [vmem:[%s4885_s2 + $0x6a0] sm:$0xff]  ;;  %v812_v6 = vld [vmem:[%s4885_s2 + $0x6c8] sm:$0xff]  ;;  %v814_v9 = vld [vmem:[%s4885_s2 + $0x6d8] sm:$0xff] }
  0xfd   : > { %v515_v41 = vpop.f32.mrb[1].mxu1  ;;  %v816_v8 = vld [vmem:[%s4885_s2 + $0x6e8] sm:$0xff]  ;;  %v818_v10 = vld [vmem:[%s4885_s2 + $0x6f8] sm:$0xff] }
  0xfe   : > { %v592_v14 = vmax.f32 %v515_v41, 0.0  ;;  %v787_v41 = vld [vmem:[%s4885_s2 + $0x600] sm:$0xff] }
  0xff   : > { %2401 = vmatpush1.bf16.msra.mxu1 %v2400_v24  ;;  %2569 = vmatpush1.bf16.msra.mxu0 %v2568_v25  ;;  %v2420_v24 = vpack.c.bf16 %v775_v15, %v771_v13  ;;  %v2588_v25 = vpack.c.bf16 %v777_v19, %v773_v18  ;;  %v811_v13 = vld [vmem:[%s4885_s2 + $0x6c0] sm:$0xff]  ;;  %v813_v18 = vld [vmem:[%s4885_s2 + $0x6d0] sm:$0xff] }
 0x100   : > { %2403 = vmatprep.subr.bf16.mxu1 %v2402_v28  ;;  %2571 = vmatprep.subr.bf16.mxu0 %v2570_v29  ;;  %v2422_v28 = vpack.c.bf16 %v784_v21, %v780_v20  ;;  %v2590_v29 = vpack.c.bf16 %v786_v23, %v782_v22  ;;  %v815_v15 = vld [vmem:[%s4885_s2 + $0x6e0] sm:$0xff]  ;;  %v817_v19 = vld [vmem:[%s4885_s2 + $0x6f0] sm:$0xff]  ;;  %v820_v20 = vld [vmem:[%s4885_s2 + $0x708] sm:$0xff] }
 0x101   : > { %1086 = vmatprep.mubr.f32.mxu1 %v592_v14  ;;  %1299 = vmatprep.mubr.f32.mxu0 %v592_v14  ;;  %v796_v14 = vld [vmem:[%s4885_s2 + $0x648] sm:$0xff]  ;;  %v822_v22 = vld [vmem:[%s4885_s2 + $0x718] sm:$0xff] }
 0x102   : > { %v824_v21 = vld [vmem:[%s4885_s2 + $0x728] sm:$0xff]  ;;  %v826_v23 = vld [vmem:[%s4885_s2 + $0x738] sm:$0xff] }
 0x103   : > { %2405 = vmatpush1.bf16.msra.mxu1 %v2404_v37  ;;  %2573 = vmatpush1.bf16.msra.mxu0 %v2572_v38  ;;  %v794_v37 = vld [vmem:[%s4885_s2 + $0x638] sm:$0xff] }
 0x104   : > { %2407 = vmatprep.subr.bf16.mxu1 %v2406_v42  ;;  %2575 = vmatprep.subr.bf16.mxu0 %v2574_v43  ;;  %v791_v42 = vld [vmem:[%s4885_s2 + $0x620] sm:$0xff]  ;;  %v2426_v43 = vpack.c.bf16 %v792_v34, %v788_v32  ;;  %v2594_v44 = vpack.c.bf16 %v794_v37, %v790_v35  ;;  %v828_v32 = vld [vmem:[%s4885_s2 + $0x748] sm:$0xff]  ;;  %v830_v35 = vld [vmem:[%s4885_s2 + $0x758] sm:$0xff] }
 0x105   : > { %v832_v34 = vld [vmem:[%s4885_s2 + $0x768] sm:$0xff]  ;;  %v834_v37 = vld [vmem:[%s4885_s2 + $0x778] sm:$0xff] }
 0x107   : > { %2409 = vmatpush1.bf16.msra.mxu1 %v2408_v50  ;;  %2577 = vmatpush1.bf16.msra.mxu0 %v2576_v51  ;;  %v2428_v50 = vpack.c.bf16 %v791_v42, %v787_v41  ;;  %v2596_v51 = vpack.c.bf16 %v793_v46, %v789_v45  ;;  %v827_v41 = vld [vmem:[%s4885_s2 + $0x740] sm:$0xff]  ;;  %v829_v45 = vld [vmem:[%s4885_s2 + $0x750] sm:$0xff] }
 0x108   : > { %2411 = vmatprep.subr.bf16.mxu1 %v2410_v54  ;;  %2579 = vmatprep.subr.bf16.mxu0 %v2578_v55  ;;  %v2430_v54 = vpack.c.bf16 %v800_v47, %v796_v14  ;;  %v2598_v55 = vpack.c.bf16 %v802_v49, %v798_v48  ;;  %v831_v42 = vld [vmem:[%s4885_s2 + $0x760] sm:$0xff]  ;;  %v833_v46 = vld [vmem:[%s4885_s2 + $0x770] sm:$0xff]  ;;  %v836_v14 = vld [vmem:[%s4885_s2 + $0x788] sm:$0xff] }
 0x109   : > { %v840_v47 = vld [vmem:[%s4885_s2 + $0x7a8] sm:$0xff]  ;;  %v838_v48 = vld [vmem:[%s4885_s2 + $0x798] sm:$0xff] }
 0x10a   : > { %v842_v49 = vld [vmem:[%s4885_s2 + $0x7b8] sm:$0xff] }
 0x10b   : > { %2413 = vmatpush1.bf16.msra.mxu1 %v2412_v62  ;;  %2581 = vmatpush1.bf16.msra.mxu0 %v2580_v63  ;;  %v2432_v62 = vpack.c.bf16 %v799_v53, %v795_v52  ;;  %v2600_v63 = vpack.c.bf16 %v801_v57, %v797_v56  ;;  %v835_v52 = vld [vmem:[%s4885_s2 + $0x780] sm:$0xff]  ;;  %v837_v56 = vld [vmem:[%s4885_s2 + $0x790] sm:$0xff] }
 0x10c   : > { %2415 = vmatprep.subr.bf16.mxu1 %v2414_v2  ;;  %2583 = vmatprep.subr.bf16.mxu0 %v2582_v3  ;;  %v2434_v2 = vpack.c.bf16 %v808_v59, %v804_v58  ;;  %v2602_v3 = vpack.c.bf16 %v810_v61, %v806_v60  ;;  %v839_v53 = vld [vmem:[%s4885_s2 + $0x7a0] sm:$0xff]  ;;  %v841_v57 = vld [vmem:[%s4885_s2 + $0x7b0] sm:$0xff]  ;;  %v844_v58 = vld [vmem:[%s4885_s2 + $0x7c8] sm:$0xff] }
 0x10d   : > { %v848_v59 = vld [vmem:[%s4885_s2 + $0x7e8] sm:$0xff]  ;;  %v846_v60 = vld [vmem:[%s4885_s2 + $0x7d8] sm:$0xff] }
 0x10e   : > { %v850_v61 = vld [vmem:[%s4885_s2 + $0x7f8] sm:$0xff] }
 0x10f   : > { %2417 = vmatpush1.bf16.msra.mxu1 %v2416_v11  ;;  %2585 = vmatpush1.bf16.msra.mxu0 %v2584_v12  ;;  %v3799_v33 = vpop.f32.mrb[2].mxu0  ;;  %v2436_v11 = vpack.c.bf16 %v807_v1, %v803_v0  ;;  %v2604_v12 = vpack.c.bf16 %v809_v5, %v805_v4  ;;  %v843_v0 = vld [vmem:[%s4885_s2 + $0x7c0] sm:$0xff]  ;;  %v845_v4 = vld [vmem:[%s4885_s2 + $0x7d0] sm:$0xff] }
 0x110   : > { %2419 = vmatprep.subr.bf16.mxu1 %v2418_v16  ;;  %2587 = vmatprep.subr.bf16.mxu0 %v2586_v17  ;;  %v3810_v38 = vpop.f32.mrb[3].mxu0  ;;  %v2438_v16 = vpack.c.bf16 %v816_v8, %v812_v6  ;;  %v2606_v17 = vpack.c.bf16 %v818_v10, %v814_v9  ;;  %v847_v1 = vld [vmem:[%s4885_s2 + $0x7e0] sm:$0xff]  ;;  %v849_v5 = vld [vmem:[%s4885_s2 + $0x7f0] sm:$0xff]  ;;  %v852_v6 = vld [vmem:[%s4885_s2 + $0x808] sm:$0xff] }
 0x111   : > { %v856_v8 = vld [vmem:[%s4885_s2 + $0x828] sm:$0xff]  ;;  %v854_v9 = vld [vmem:[%s4885_s2 + $0x818] sm:$0xff] }
 0x112   : > { %v858_v10 = vld [vmem:[%s4885_s2 + $0x838] sm:$0xff] }
 0x113   : > { %2421 = vmatpush1.bf16.msra.mxu1 %v2420_v24  ;;  %2589 = vmatpush1.bf16.msra.mxu0 %v2588_v25  ;;  %v2440_v24 = vpack.c.bf16 %v815_v15, %v811_v13  ;;  %v2608_v25 = vpack.c.bf16 %v817_v19, %v813_v18  ;;  %v851_v13 = vld [vmem:[%s4885_s2 + $0x800] sm:$0xff]  ;;  %v853_v18 = vld [vmem:[%s4885_s2 + $0x810] sm:$0xff] }
 0x114   : > { %2423 = vmatprep.subr.bf16.mxu1 %v2422_v28  ;;  %2591 = vmatprep.subr.bf16.mxu0 %v2590_v29  ;;  %v2442_v28 = vpack.c.bf16 %v824_v21, %v820_v20  ;;  %v2610_v29 = vpack.c.bf16 %v826_v23, %v822_v22  ;;  %v855_v15 = vld [vmem:[%s4885_s2 + $0x820] sm:$0xff]  ;;  %v857_v19 = vld [vmem:[%s4885_s2 + $0x830] sm:$0xff]  ;;  %v860_v20 = vld [vmem:[%s4885_s2 + $0x848] sm:$0xff] }
 0x115   : > { %v864_v21 = vld [vmem:[%s4885_s2 + $0x868] sm:$0xff]  ;;  %v862_v22 = vld [vmem:[%s4885_s2 + $0x858] sm:$0xff] }
 0x116   : > { %v866_v23 = vld [vmem:[%s4885_s2 + $0x878] sm:$0xff] }
 0x117   : > { %2425 = vmatpush1.bf16.msra.mxu1 %v2424_v39  ;;  %2593 = vmatpush1.bf16.msra.mxu0 %v2592_v40  ;;  %v2444_v39 = vpack.c.bf16 %v823_v27, %v819_v26  ;;  %v2612_v40 = vpack.c.bf16 %v825_v31, %v821_v30  ;;  %v2628_v26 = vpack.c.bf16 %v857_v19, %v853_v18  ;;  %v859_v27 = vld [vmem:[%s4885_s2 + $0x840] sm:$0xff]  ;;  %v865_v31 = vld [vmem:[%s4885_s2 + $0x870] sm:$0xff] }
 0x118   : > { %2427 = vmatprep.subr.bf16.mxu1 %v2426_v43  ;;  %2595 = vmatprep.subr.bf16.mxu0 %v2594_v44  ;;  %v2446_v43 = vpack.c.bf16 %v832_v34, %v828_v32  ;;  %v2614_v44 = vpack.c.bf16 %v834_v37, %v830_v35  ;;  %v2630_v30 = vpack.c.bf16 %v866_v23, %v862_v22  ;;  %v868_v32 = vld [vmem:[%s4885_s2 + $0x888] sm:$0xff]  ;;  %v870_v35 = vld [vmem:[%s4885_s2 + $0x898] sm:$0xff]  ;;  %v893_v18 = vld [vmem:[%s4885_s2 + $0x950] sm:$0xff] }
 0x119   : > { %v872_v34 = vld [vmem:[%s4885_s2 + $0x8a8] sm:$0xff]  ;;  %v874_v37 = vld [vmem:[%s4885_s2 + $0x8b8] sm:$0xff]  ;;  %v897_v19 = vld [vmem:[%s4885_s2 + $0x970] sm:$0xff] }
 0x11a   : > { %v902_v22 = vld [vmem:[%s4885_s2 + $0x998] sm:$0xff] }
 0x11b   : > { %2429 = vmatpush1.bf16.msra.mxu1 %v2428_v50  ;;  %2597 = vmatpush1.bf16.msra.mxu0 %v2596_v51  ;;  %v2448_v50 = vpack.c.bf16 %v831_v42, %v827_v41  ;;  %v2616_v51 = vpack.c.bf16 %v833_v46, %v829_v45  ;;  %v867_v42 = vld [vmem:[%s4885_s2 + $0x880] sm:$0xff]  ;;  %v2634_v45 = vpack.c.bf16 %v874_v37, %v870_v35  ;;  %v873_v46 = vld [vmem:[%s4885_s2 + $0x8b0] sm:$0xff]  ;;  %v906_v23 = vld [vmem:[%s4885_s2 + $0x9b8] sm:$0xff] }
 0x11c   : > { %2431 = vmatprep.subr.bf16.mxu1 %v2430_v54  ;;  %2599 = vmatprep.subr.bf16.mxu0 %v2598_v55  ;;  %v2450_v54 = vpack.c.bf16 %v840_v47, %v836_v14  ;;  %v2618_v55 = vpack.c.bf16 %v842_v49, %v838_v48  ;;  %v876_v14 = vld [vmem:[%s4885_s2 + $0x8c8] sm:$0xff]  ;;  %v878_v48 = vld [vmem:[%s4885_s2 + $0x8d8] sm:$0xff] }
 0x11d   : > { %v880_v47 = vld [vmem:[%s4885_s2 + $0x8e8] sm:$0xff]  ;;  %v882_v49 = vld [vmem:[%s4885_s2 + $0x8f8] sm:$0xff] }
 0x11e   : > { %v914_v35 = vld [vmem:[%s4885_s2 + $0x9f8] sm:$0xff] }
 0x11f   : > { %2433 = vmatpush1.bf16.msra.mxu1 %v2432_v62  ;;  %2601 = vmatpush1.bf16.msra.mxu0 %v2600_v63  ;;  %v2452_v62 = vpack.c.bf16 %v839_v53, %v835_v52  ;;  %v2620_v63 = vpack.c.bf16 %v841_v57, %v837_v56  ;;  %v875_v52 = vld [vmem:[%s4885_s2 + $0x8c0] sm:$0xff]  ;;  %v877_v56 = vld [vmem:[%s4885_s2 + $0x8d0] sm:$0xff] }
 0x120   : > { %2435 = vmatprep.subr.bf16.mxu1 %v2434_v2  ;;  %2603 = vmatprep.subr.bf16.mxu0 %v2602_v3  ;;  %v2454_v2 = vpack.c.bf16 %v848_v59, %v844_v58  ;;  %v2622_v3 = vpack.c.bf16 %v850_v61, %v846_v60  ;;  %v879_v53 = vld [vmem:[%s4885_s2 + $0x8e0] sm:$0xff]  ;;  %v881_v57 = vld [vmem:[%s4885_s2 + $0x8f0] sm:$0xff]  ;;  %v884_v58 = vld [vmem:[%s4885_s2 + $0x908] sm:$0xff] }
 0x121   : > { %v888_v59 = vld [vmem:[%s4885_s2 + $0x928] sm:$0xff]  ;;  %v886_v60 = vld [vmem:[%s4885_s2 + $0x918] sm:$0xff] }
 0x122   : > { %v890_v61 = vld [vmem:[%s4885_s2 + $0x938] sm:$0xff] }
 0x123   : > { %2437 = vmatpush1.bf16.msra.mxu1 %v2436_v11  ;;  %2605 = vmatpush1.bf16.msra.mxu0 %v2604_v12  ;;  %v2456_v11 = vpack.c.bf16 %v847_v1, %v843_v0  ;;  %v2624_v12 = vpack.c.bf16 %v849_v5, %v845_v4  ;;  %v883_v0 = vld [vmem:[%s4885_s2 + $0x900] sm:$0xff]  ;;  %v885_v4 = vld [vmem:[%s4885_s2 + $0x910] sm:$0xff] }
 0x124   : > { %2439 = vmatprep.subr.bf16.mxu1 %v2438_v16  ;;  %2607 = vmatprep.subr.bf16.mxu0 %v2606_v17  ;;  %v2458_v16 = vpack.c.bf16 %v856_v8, %v852_v6  ;;  %v2626_v17 = vpack.c.bf16 %v858_v10, %v854_v9  ;;  %v887_v1 = vld [vmem:[%s4885_s2 + $0x920] sm:$0xff]  ;;  %v889_v5 = vld [vmem:[%s4885_s2 + $0x930] sm:$0xff]  ;;  %v892_v6 = vld [vmem:[%s4885_s2 + $0x948] sm:$0xff] }
 0x125   : > { %v896_v8 = vld [vmem:[%s4885_s2 + $0x968] sm:$0xff]  ;;  %v894_v9 = vld [vmem:[%s4885_s2 + $0x958] sm:$0xff] }
 0x126   : > { %v898_v10 = vld [vmem:[%s4885_s2 + $0x978] sm:$0xff] }
 0x127   : > { %2441 = vmatpush1.bf16.msra.mxu1 %v2440_v24  ;;  %2609 = vmatpush1.bf16.msra.mxu0 %v2608_v25  ;;  %v591_v24 = vmax.f32 %v3686_v36, 0.0  ;;  %v2460_v25 = vpack.c.bf16 %v855_v15, %v851_v13  ;;  %v861_v36 = vld [vmem:[%s4885_s2 + $0x850] sm:$0xff]  ;;  %v891_v13 = vld [vmem:[%s4885_s2 + $0x940] sm:$0xff] }
 0x128   : > { %2443 = vmatprep.subr.bf16.mxu1 %v2442_v28  ;;  %2611 = vmatprep.subr.bf16.mxu0 %v2610_v29  ;;  %v863_v28 = vld [vmem:[%s4885_s2 + $0x860] sm:$0xff]  ;;  %v2462_v29 = vpack.c.bf16 %v864_v21, %v860_v20  ;;  %v2632_v41 = vpack.c.bf16 %v865_v31, %v861_v36  ;;  %v900_v20 = vld [vmem:[%s4885_s2 + $0x988] sm:$0xff]  ;;  %v905_v36 = vld [vmem:[%s4885_s2 + $0x9b0] sm:$0xff] }
 0x129   : > { %v895_v15 = vld [vmem:[%s4885_s2 + $0x960] sm:$0xff]  ;;  %v904_v21 = vld [vmem:[%s4885_s2 + $0x9a8] sm:$0xff] }
 0x12a   : > { %v908_v31 = vld [vmem:[%s4885_s2 + $0x9c8] sm:$0xff] }
 0x12b   : > { %2445 = vmatpush1.bf16.msra.mxu1 %v2444_v39  ;;  %2613 = vmatpush1.bf16.msra.mxu0 %v2612_v40  ;;  %v594_v39 = vmax.f32 %v3810_v38, 0.0  ;;  %v2464_v40 = vpack.c.bf16 %v863_v28, %v859_v27  ;;  %v869_v38 = vld [vmem:[%s4885_s2 + $0x890] sm:$0xff]  ;;  %v903_v27 = vld [vmem:[%s4885_s2 + $0x9a0] sm:$0xff]  ;;  %v2482_v28 = vpack.c.bf16 %v904_v21, %v900_v20 }
 0x12c   : > { %2447 = vmatprep.subr.bf16.mxu1 %v2446_v43  ;;  %2615 = vmatprep.subr.bf16.mxu0 %v2614_v44  ;;  %v871_v43 = vld [vmem:[%s4885_s2 + $0x8a0] sm:$0xff]  ;;  %v2466_v44 = vpack.c.bf16 %v872_v34, %v868_v32  ;;  %v912_v32 = vld [vmem:[%s4885_s2 + $0x9e8] sm:$0xff]  ;;  %v910_v34 = vld [vmem:[%s4885_s2 + $0x9d8] sm:$0xff] }
 0x12f   : > { %2449 = vmatpush1.bf16.msra.mxu1 %v2448_v50  ;;  %2617 = vmatpush1.bf16.msra.mxu0 %v2616_v51  ;;  %v2468_v50 = vpack.c.bf16 %v871_v43, %v867_v42  ;;  %v2636_v51 = vpack.c.bf16 %v873_v46, %v869_v38  ;;  %v2486_v42 = vpack.c.bf16 %v912_v32, %v908_v31  ;;  %v916_v38 = vld [vmem:[%s4885_s2 + $0xa08] sm:$0xff]  ;;  %v1393_v32 = vld [vmem:[%s4886_s3 + $0x60] sm:$0xff] }
 0x130   : > { %2451 = vmatprep.subr.bf16.mxu1 %v2450_v54  ;;  %2619 = vmatprep.subr.bf16.mxu0 %v2618_v55  ;;  %v2470_v54 = vpack.c.bf16 %v880_v47, %v876_v14  ;;  %v2638_v55 = vpack.c.bf16 %v882_v49, %v878_v48  ;;  %v2654_v43 = vpack.c.bf16 %v914_v35, %v910_v34  ;;  %v920_v46 = vld [vmem:[%s4885_s2 + $0xa28] sm:$0xff]  ;;  %v918_v14 = vld [vmem:[%s4885_s2 + $0xa18] sm:$0xff]  ;;  %v1395_v34 = vld [vmem:[%s4886_s3 + $0x70] sm:$0xff] }
 0x131   : > { %v922_v47 = vld [vmem:[%s4885_s2 + $0xa38] sm:$0xff]  ;;  %v1398_v35 = vld [vmem:[%s4886_s3 + $0x88] sm:$0xff] }
 0x133   : > { %2453 = vmatpush1.bf16.msra.mxu1 %v2452_v62  ;;  %2621 = vmatpush1.bf16.msra.mxu0 %v2620_v63  ;;  %v2472_v62 = vpack.c.bf16 %v879_v53, %v875_v52  ;;  %v2640_v63 = vpack.c.bf16 %v881_v57, %v877_v56  ;;  %v2490_v52 = vpack.c.bf16 %v920_v46, %v916_v38  ;;  %v924_v56 = vld [vmem:[%s4885_s2 + $0xa48] sm:$0xff]  ;;  %v1401_v46 = vld [vmem:[%s4886_s3 + $0xa0] sm:$0xff] }
 0x134   : > { %2455 = vmatprep.subr.bf16.mxu1 %v2454_v2  ;;  %2623 = vmatprep.subr.bf16.mxu0 %v2622_v3  ;;  %v2474_v2 = vpack.c.bf16 %v888_v59, %v884_v58  ;;  %v2642_v3 = vpack.c.bf16 %v890_v61, %v886_v60  ;;  %v2658_v53 = vpack.c.bf16 %v922_v47, %v918_v14  ;;  %v928_v57 = vld [vmem:[%s4885_s2 + $0xa68] sm:$0xff]  ;;  %v926_v58 = vld [vmem:[%s4885_s2 + $0xa58] sm:$0xff]  ;;  %v1403_v14 = vld [vmem:[%s4886_s3 + $0xb0] sm:$0xff] }
 0x135   : > { %v930_v59 = vld [vmem:[%s4885_s2 + $0xa78] sm:$0xff]  ;;  %v1406_v47 = vld [vmem:[%s4886_s3 + $0xc8] sm:$0xff] }
 0x137   : > { %2457 = vmatpush1.bf16.msra.mxu1 %v2456_v11  ;;  %2625 = vmatpush1.bf16.msra.mxu0 %v2624_v12  ;;  %v2476_v11 = vpack.c.bf16 %v887_v1, %v883_v0  ;;  %v2644_v12 = vpack.c.bf16 %v889_v5, %v885_v4  ;;  %v2662_v0 = vpack.c.bf16 %v930_v59, %v926_v58  ;;  %v927_v1 = vld [vmem:[%s4885_s2 + $0xa60] sm:$0xff]  ;;  %v1411_v58 = vld [vmem:[%s4886_s3 + $0xf0] sm:$0xff]  ;;  %v1414_v59 = vld [vmem:[%s4886_s3 + $0x108] sm:$0xff] }
 0x138   : > { %2459 = vmatprep.subr.bf16.mxu1 %v2458_v16  ;;  %2627 = vmatprep.subr.bf16.mxu0 %v2626_v17  ;;  %v2478_v16 = vpack.c.bf16 %v896_v8, %v892_v6  ;;  %v2646_v17 = vpack.c.bf16 %v898_v10, %v894_v9  ;;  %v932_v6 = vld [vmem:[%s4885_s2 + $0xa88] sm:$0x1]  ;;  %v934_v8 = vld [vmem:[%s4885_s2 + $0xa98] sm:$0x1] }
 0x139   : > { %v1382_v9 = vld [vmem:[%s4886_s3 + $0x8] sm:$0xff]  ;;  %v1384_v10 = vld [vmem:[%s4886_s3 + $0x18] sm:$0xff] }
 0x13a   : > { %1087 = vmatmul.mubr.f32.vlgmr.msra.gmra.mrb[2].mxu1 %v591_v24  ;;  %1300 = vmatmul.mubr.f32.vlgmr.msra.gmra.mrb[4].mxu0 %v591_v24  ;;  %v2480_v24 = vpack.c.bf16 %v895_v15, %v891_v13  ;;  %v1383_v13 = vld [vmem:[%s4886_s3 + $0x10] sm:$0xff] }
 0x13b   : > { %2461 = vmatpush1.bf16.msra.mxu1 %v2460_v25  ;;  %2629 = vmatpush1.bf16.msra.mxu0 %v2628_v26  ;;  %v2648_v25 = vpack.c.bf16 %v897_v19, %v893_v18  ;;  %v899_v26 = vld [vmem:[%s4885_s2 + $0x980] sm:$0xff]  ;;  %v933_v15 = vld [vmem:[%s4885_s2 + $0xa90] sm:$0x1]  ;;  %v2666_v18 = vpack.c.bf16 %v1384_v10, %v1382_v9  ;;  %v593_v19 = vmax.f32 %v3799_v33, 0.0  ;;  %v1390_v33 = vld [vmem:[%s4886_s3 + $0x48] sm:$0xff] }
 0x13c   : > { %2463 = vmatprep.subr.bf16.mxu1 %v2462_v29  ;;  %2631 = vmatprep.subr.bf16.mxu0 %v2630_v30  ;;  %v2650_v29 = vpack.c.bf16 %v906_v23, %v902_v22  ;;  %v901_v30 = vld [vmem:[%s4885_s2 + $0x990] sm:$0xff]  ;;  %v2484_v37 = vpack.c.bf16 %v903_v27, %v899_v26  ;;  %v1385_v22 = vld [vmem:[%s4886_s3 + $0x20] sm:$0xff]  ;;  %v1424_v9 = vld [vmem:[%s4886_s3 + $0x158] sm:$0xff] }
 0x13d   : > { %2185 = vmatprep.mubr.msk.f32.mxu1 %vm935_vm2, %v594_v39  ;;  %2188 = vmatprep.mubr.msk.f32.mxu0 %vm935_vm2, %v594_v39  ;;  %v2652_v39 = vpack.c.bf16 %v905_v36, %v901_v30  ;;  %v1387_v23 = vld [vmem:[%s4886_s3 + $0x30] sm:$0xff]  ;;  %v1389_v27 = vld [vmem:[%s4886_s3 + $0x40] sm:$0xff]  ;;  %v1396_v30 = vld [vmem:[%s4886_s3 + $0x78] sm:$0xff] }
 0x13f   : > { %2465 = vmatpush1.bf16.msra.mxu1 %v2464_v40  ;;  %2633 = vmatpush1.bf16.msra.mxu0 %v2632_v41  ;;  %v907_v40 = vld [vmem:[%s4885_s2 + $0x9c0] sm:$0xff] }
 0x140   : > { %2467 = vmatprep.subr.bf16.mxu1 %v2466_v44  ;;  %2635 = vmatprep.subr.bf16.mxu0 %v2634_v45  ;;  %v911_v41 = vld [vmem:[%s4885_s2 + $0x9e0] sm:$0xff]  ;;  %v909_v44 = vld [vmem:[%s4885_s2 + $0x9d0] sm:$0xff] }
 0x141   : > { %v913_v45 = vld [vmem:[%s4885_s2 + $0x9f0] sm:$0xff]  ;;  %v2488_v48 = vpack.c.bf16 %v911_v41, %v907_v40  ;;  %v1397_v41 = vld [vmem:[%s4886_s3 + $0x80] sm:$0xff] }
 0x142   : > { %v2656_v49 = vpack.c.bf16 %v913_v45, %v909_v44  ;;  %v1404_v44 = vld [vmem:[%s4886_s3 + $0xb8] sm:$0xff] }
 0x143   : > { %2469 = vmatpush1.bf16.msra.mxu1 %v2468_v50  ;;  %2637 = vmatpush1.bf16.msra.mxu0 %v2636_v51  ;;  %v915_v50 = vld [vmem:[%s4885_s2 + $0xa00] sm:$0xff] }
 0x144   : > { %2471 = vmatprep.subr.bf16.mxu1 %v2470_v54  ;;  %2639 = vmatprep.subr.bf16.mxu0 %v2638_v55  ;;  %v919_v51 = vld [vmem:[%s4885_s2 + $0xa20] sm:$0xff]  ;;  %v917_v54 = vld [vmem:[%s4885_s2 + $0xa10] sm:$0xff] }
 0x145   : > { %v921_v55 = vld [vmem:[%s4885_s2 + $0xa30] sm:$0xff]  ;;  %v2492_v60 = vpack.c.bf16 %v919_v51, %v915_v50  ;;  %v1405_v51 = vld [vmem:[%s4886_s3 + $0xc0] sm:$0xff] }
 0x146   : > { %v2660_v61 = vpack.c.bf16 %v921_v55, %v917_v54  ;;  %v1412_v54 = vld [vmem:[%s4886_s3 + $0xf8] sm:$0xff] }
 0x147   : > { %2473 = vmatpush1.bf16.msra.mxu1 %v2472_v62  ;;  %2641 = vmatpush1.bf16.msra.mxu0 %v2640_v63  ;;  %v923_v62 = vld [vmem:[%s4885_s2 + $0xa40] sm:$0xff]  ;;  %v2494_v63 = vpack.c.bf16 %v928_v57, %v924_v56 }
 0x148   : > { %2475 = vmatprep.subr.bf16.mxu1 %v2474_v2  ;;  %2643 = vmatprep.subr.bf16.mxu0 %v2642_v3  ;;  %v925_v2 = vld [vmem:[%s4885_s2 + $0xa50] sm:$0xff]  ;;  %v2496_v4 = vpack.c.bf16 %v927_v1, %v923_v62  ;;  %v1409_v57 = vld [vmem:[%s4886_s3 + $0xe0] sm:$0xff]  ;;  %v1418_v1 = vld [vmem:[%s4886_s3 + $0x128] sm:$0xff] }
 0x149   : > { %v929_v3 = vld [vmem:[%s4885_s2 + $0xa70] sm:$0xff] }
 0x14a   : > { %v2664_v5 = vpack.c.bf16 %v929_v3, %v925_v2  ;;  %v1420_v2 = vld [vmem:[%s4886_s3 + $0x138] sm:$0xff] }
 0x14b   : > { %2477 = vmatpush1.bf16.msra.mxu1 %v2476_v11  ;;  %2645 = vmatpush1.bf16.msra.mxu0 %v2644_v12  ;;  %v931_v11 = vld [vmem:[%s4885_s2 + $0xa80] sm:$0x1] }
 0x14c   : > { %2479 = vmatprep.subr.bf16.mxu1 %v2478_v16  ;;  %2647 = vmatprep.subr.bf16.mxu0 %v2646_v17  ;;  %v1381_v12 = vld [vmem:[%s4886_s3] sm:$0xff]  ;;  %v1386_v16 = vld [vmem:[%s4886_s3 + $0x28] sm:$0xff]  ;;  %v1388_v17 = vld [vmem:[%s4886_s3 + $0x38] sm:$0xff] }
 0x14d   : > { %v2668_v20 = vpack.c.bf16 %v1383_v13, %v1381_v12  ;;  %v2670_v21 = vpack.c.bf16 %v1388_v17, %v1386_v16  ;;  %v1421_v12 = vld [vmem:[%s4886_s3 + $0x140] sm:$0xff]  ;;  %v1423_v13 = vld [vmem:[%s4886_s3 + $0x150] sm:$0xff]  ;;  %v1428_v16 = vld [vmem:[%s4886_s3 + $0x178] sm:$0xff] }
 0x14e   : > { %v2708_v17 = vpack.c.bf16 %v1423_v13, %v1421_v12  ;;  %v1657_v12 = vld [vmem:[%s4887_s4 + $0xc0] sm:$0xff]  ;;  %v1660_v13 = vld [vmem:[%s4887_s4 + $0xd8] sm:$0xff] }
 0x14f   : > { %2481 = vmatpush1.bf16.msra.mxu1 %v2480_v24  ;;  %2649 = vmatpush1.bf16.msra.mxu0 %v2648_v25  ;;  %v1392_v24 = vld [vmem:[%s4886_s3 + $0x58] sm:$0xff]  ;;  %v2672_v25 = vpack.c.bf16 %v1387_v23, %v1385_v22 }
 0x150   : > { %2483 = vmatprep.subr.bf16.mxu1 %v2482_v28  ;;  %2651 = vmatprep.subr.bf16.mxu0 %v2650_v29  ;;  %v2674_v26 = vpack.c.bf16 %v1392_v24, %v1390_v33  ;;  %v1391_v28 = vld [vmem:[%s4886_s3 + $0x50] sm:$0xff]  ;;  %v1394_v29 = vld [vmem:[%s4886_s3 + $0x68] sm:$0xff]  ;;  %v1432_v22 = vld [vmem:[%s4886_s3 + $0x198] sm:$0xff] }
 0x151   : > { %v2676_v36 = vpack.c.bf16 %v1391_v28, %v1389_v27  ;;  %v2678_v31 = vpack.c.bf16 %v1396_v30, %v1394_v29  ;;  %v1429_v24 = vld [vmem:[%s4886_s3 + $0x180] sm:$0xff]  ;;  %v1436_v27 = vld [vmem:[%s4886_s3 + $0x1b8] sm:$0xff] }
 0x152   : > { %v1433_v30 = vld [vmem:[%s4886_s3 + $0x1a0] sm:$0xff] }
 0x153   : > { %2485 = vmatpush1.bf16.msra.mxu1 %v2484_v37  ;;  %2653 = vmatpush1.bf16.msra.mxu0 %v2652_v39  ;;  %v1400_v37 = vld [vmem:[%s4886_s3 + $0x98] sm:$0xff]  ;;  %v2680_v39 = vpack.c.bf16 %v1395_v34, %v1393_v32 }
 0x154   : > { %2487 = vmatprep.subr.bf16.mxu1 %v2486_v42  ;;  %2655 = vmatprep.subr.bf16.mxu0 %v2654_v43  ;;  %v2682_v40 = vpack.c.bf16 %v1400_v37, %v1398_v35  ;;  %v1399_v42 = vld [vmem:[%s4886_s3 + $0x90] sm:$0xff]  ;;  %v1402_v43 = vld [vmem:[%s4886_s3 + $0xa8] sm:$0xff]  ;;  %v1440_v32 = vld [vmem:[%s4886_s3 + $0x1d8] sm:$0xff] }
 0x155   : > { %v2684_v45 = vpack.c.bf16 %v1399_v42, %v1397_v41  ;;  %v2686_v38 = vpack.c.bf16 %v1404_v44, %v1402_v43  ;;  %v1437_v37 = vld [vmem:[%s4886_s3 + $0x1c0] sm:$0xff]  ;;  %v1442_v41 = vld [vmem:[%s4886_s3 + $0x1e8] sm:$0xff]  ;;  %v1444_v42 = vld [vmem:[%s4886_s3 + $0x1f8] sm:$0xff] }
 0x156   : > { %v2726_v43 = vpack.c.bf16 %v1444_v42, %v1442_v41  ;;  %v1441_v44 = vld [vmem:[%s4886_s3 + $0x1e0] sm:$0xff]  ;;  %v1691_v41 = vld [vmem:[%s4887_s4 + $0x1d0] sm:$0xff] }
 0x157   : > { %2489 = vmatpush1.bf16.msra.mxu1 %v2488_v48  ;;  %2657 = vmatpush1.bf16.msra.mxu0 %v2656_v49  ;;  %v1408_v48 = vld [vmem:[%s4886_s3 + $0xd8] sm:$0xff]  ;;  %v2688_v49 = vpack.c.bf16 %v1403_v14, %v1401_v46  ;;  %v1446_v46 = vld [vmem:[%s4886_s3 + $0x208] sm:$0xff] }
 0x158   : > { %2491 = vmatprep.subr.bf16.mxu1 %v2490_v52  ;;  %2659 = vmatprep.subr.bf16.mxu0 %v2658_v53  ;;  %v2690_v50 = vpack.c.bf16 %v1408_v48, %v1406_v47  ;;  %v1407_v52 = vld [vmem:[%s4886_s3 + $0xd0] sm:$0xff]  ;;  %v1410_v53 = vld [vmem:[%s4886_s3 + $0xe8] sm:$0xff]  ;;  %v1448_v14 = vld [vmem:[%s4886_s3 + $0x218] sm:$0xff] }
 0x159   : > { %v2692_v55 = vpack.c.bf16 %v1407_v52, %v1405_v51  ;;  %v2694_v56 = vpack.c.bf16 %v1412_v54, %v1410_v53  ;;  %v2730_v47 = vpack.c.bf16 %v1448_v14, %v1446_v46  ;;  %v1634_v48 = vld [vmem:[%s4887_s4 + $0x8] sm:$0xff]  ;;  %v1636_v52 = vld [vmem:[%s4887_s4 + $0x18] sm:$0xff]  ;;  %v1643_v54 = vld [vmem:[%s4887_s4 + $0x50] sm:$0xff] }
 0x15a   : > { %v1640_v53 = vld [vmem:[%s4887_s4 + $0x38] sm:$0xff]  ;;  %v1445_v46 = vld [vmem:[%s4886_s3 + $0x200] sm:$0xff]  ;;  %v1447_v14 = vld [vmem:[%s4886_s3 + $0x210] sm:$0xff] }
 0x15b   : > { %2493 = vmatpush1.bf16.msra.mxu1 %v2492_v60  ;;  %2661 = vmatpush1.bf16.msra.mxu0 %v2660_v61  ;;  %v1416_v60 = vld [vmem:[%s4886_s3 + $0x118] sm:$0xff]  ;;  %v2696_v61 = vpack.c.bf16 %v1411_v58, %v1409_v57  ;;  %v1639_v57 = vld [vmem:[%s4887_s4 + $0x30] sm:$0xff]  ;;  %v1642_v58 = vld [vmem:[%s4887_s4 + $0x48] sm:$0xff] }
 0x15c   : > { %2495 = vmatprep.subr.bf16.mxu1 %v2494_v63  ;;  %2663 = vmatprep.subr.bf16.mxu0 %v2662_v0  ;;  %v2698_v62 = vpack.c.bf16 %v1416_v60, %v1414_v59  ;;  %v1413_v63 = vld [vmem:[%s4886_s3 + $0x100] sm:$0xff]  ;;  %v1415_v0 = vld [vmem:[%s4886_s3 + $0x110] sm:$0xff]  ;;  %v1646_v59 = vld [vmem:[%s4887_s4 + $0x68] sm:$0xff] }
 0x15d   : > { %v2700_v3 = vpack.c.bf16 %v1415_v0, %v1413_v63  ;;  %v1649_v60 = vld [vmem:[%s4887_s4 + $0x80] sm:$0xff]  ;;  %v1648_v0 = vld [vmem:[%s4887_s4 + $0x78] sm:$0xff] }
 0x15e   : > { %v1645_v63 = vld [vmem:[%s4887_s4 + $0x60] sm:$0xff] }
 0x15f   : > { %2497 = vmatpush1.bf16.msra.mxu1 %v2496_v4  ;;  %2665 = vmatpush1.bf16.msra.mxu0 %v2664_v5  ;;  %v2702_v4 = vpack.c.bf16 %v1420_v2, %v1418_v1  ;;  %v1417_v5 = vld [vmem:[%s4886_s3 + $0x120] sm:$0xff]  ;;  %v1652_v1 = vld [vmem:[%s4887_s4 + $0x98] sm:$0xff]  ;;  %v1655_v2 = vld [vmem:[%s4887_s4 + $0xb0] sm:$0xff] }
 0x160   : > { %2183 = vmatprep.subr.msk.mxu1 %vm357_vm0, %v932_v6  ;;  %2186 = vmatprep.subr.msk.mxu0 %vm357_vm0, %v934_v8  ;;  %v1419_v6 = vld [vmem:[%s4886_s3 + $0x130] sm:$0xff]  ;;  %v1422_v8 = vld [vmem:[%s4886_s3 + $0x148] sm:$0xff] }
 0x161   : > { %v2704_v10 = vpack.c.bf16 %v1419_v6, %v1417_v5  ;;  %v1651_v5 = vld [vmem:[%s4887_s4 + $0x90] sm:$0xff]  ;;  %v1654_v6 = vld [vmem:[%s4887_s4 + $0xa8] sm:$0xff] }
 0x163   : > { %2184 = vmatpush1.msk.msra.mxu1 %vm357_vm0, %v931_v11  ;;  %2187 = vmatpush1.msk.msra.mxu0 %vm357_vm0, %v933_v15  ;;  %v2706_v11 = vpack.c.bf16 %v1424_v9, %v1422_v8  ;;  %v1426_v15 = vld [vmem:[%s4886_s3 + $0x168] sm:$0xff]  ;;  %v1661_v9 = vld [vmem:[%s4887_s4 + $0xe0] sm:$0xff] }
 0x164   : > { %1158 = vmatmul.mubr.f32.vlgmr.msra.gmra.mrb[2].mxu1 %v593_v19  ;;  %1371 = vmatmul.mubr.f32.vlgmr.msra.gmra.mrb[4].mxu0 %v593_v19  ;;  %v1425_v19 = vld [vmem:[%s4886_s3 + $0x160] sm:$0xff]  ;;  %v1658_v8 = vld [vmem:[%s4887_s4 + $0xc8] sm:$0xff] }
 0x165   : > { %2667 = vmatprep.subr.bf16.mxu1 %v2666_v18  ;;  %v2710_v18 = vpack.c.bf16 %v1428_v16, %v1426_v15  ;;  %v1664_v15 = vld [vmem:[%s4887_s4 + $0xf8] sm:$0xff]  ;;  %v1667_v16 = vld [vmem:[%s4887_s4 + $0x110] sm:$0xff] }
 0x166   : > { %2669 = vmatpush1.bf16.msra.mxu1 %v2668_v20  ;;  %v1427_v20 = vld [vmem:[%s4886_s3 + $0x170] sm:$0xff] }
 0x167   : > { %2671 = vmatprep.subr.bf16.mxu1 %v2670_v21  ;;  %v1430_v21 = vld [vmem:[%s4886_s3 + $0x188] sm:$0xff]  ;;  %v2712_v23 = vpack.c.bf16 %v1427_v20, %v1425_v19  ;;  %v1663_v19 = vld [vmem:[%s4887_s4 + $0xf0] sm:$0xff] }
 0x168   : > { %v2714_v33 = vpack.c.bf16 %v1432_v22, %v1430_v21  ;;  %v1666_v20 = vld [vmem:[%s4887_s4 + $0x108] sm:$0xff]  ;;  %v1673_v22 = vld [vmem:[%s4887_s4 + $0x140] sm:$0xff] }
 0x169   : > { %v1670_v21 = vld [vmem:[%s4887_s4 + $0x128] sm:$0xff] }
 0x16a   : > { %2673 = vmatpush1.bf16.msra.mxu1 %v2672_v25  ;;  %v1431_v25 = vld [vmem:[%s4886_s3 + $0x190] sm:$0xff] }
 0x16b   : > { %2675 = vmatprep.subr.bf16.mxu1 %v2674_v26  ;;  %v1434_v26 = vld [vmem:[%s4886_s3 + $0x1a8] sm:$0xff]  ;;  %v2716_v28 = vpack.c.bf16 %v1431_v25, %v1429_v24  ;;  %v1669_v24 = vld [vmem:[%s4887_s4 + $0x120] sm:$0xff]  ;;  %v1672_v25 = vld [vmem:[%s4887_s4 + $0x138] sm:$0xff] }
 0x16c   : > { %v2718_v29 = vpack.c.bf16 %v1436_v27, %v1434_v26  ;;  %v1676_v26 = vld [vmem:[%s4887_s4 + $0x158] sm:$0xff]  ;;  %v1679_v27 = vld [vmem:[%s4887_s4 + $0x170] sm:$0xff] }
 0x16e   : > { %2677 = vmatpush1.bf16.msra.mxu1 %v2676_v36  ;;  %v1435_v36 = vld [vmem:[%s4886_s3 + $0x1b0] sm:$0xff] }
 0x16f   : > { %2679 = vmatprep.subr.bf16.mxu1 %v2678_v31  ;;  %v1438_v31 = vld [vmem:[%s4886_s3 + $0x1c8] sm:$0xff]  ;;  %v2720_v34 = vpack.c.bf16 %v1435_v36, %v1433_v30  ;;  %v1675_v30 = vld [vmem:[%s4887_s4 + $0x150] sm:$0xff] }
 0x170   : > { %v2722_v35 = vpack.c.bf16 %v1440_v32, %v1438_v31  ;;  %v1678_v36 = vld [vmem:[%s4887_s4 + $0x168] sm:$0xff]  ;;  %v1685_v32 = vld [vmem:[%s4887_s4 + $0x1a0] sm:$0xff] }
 0x171   : > { %v1682_v31 = vld [vmem:[%s4887_s4 + $0x188] sm:$0xff] }
 0x172   : > { %2681 = vmatpush1.bf16.msra.mxu1 %v2680_v39  ;;  %v1439_v39 = vld [vmem:[%s4886_s3 + $0x1d0] sm:$0xff] }
 0x173   : > { %2683 = vmatprep.subr.bf16.mxu1 %v2682_v40  ;;  %v2724_v40 = vpack.c.bf16 %v1439_v39, %v1437_v37  ;;  %v1681_v37 = vld [vmem:[%s4887_s4 + $0x180] sm:$0xff]  ;;  %v1684_v39 = vld [vmem:[%s4887_s4 + $0x198] sm:$0xff] }
 0x174   : > { %v2796_v42 = vpack.c.bf16 %v1684_v39, %v1681_v37  ;;  %v1694_v39 = vld [vmem:[%s4887_s4 + $0x1e8] sm:$0x1] }
 0x176   : > { %2685 = vmatpush1.bf16.msra.mxu1 %v2684_v45  ;;  %v1443_v45 = vld [vmem:[%s4886_s3 + $0x1f0] sm:$0xff] }
 0x177   : > { %2687 = vmatprep.subr.bf16.mxu1 %v2686_v38  ;;  %v2728_v38 = vpack.c.bf16 %v1443_v45, %v1441_v44  ;;  %v1687_v44 = vld [vmem:[%s4887_s4 + $0x1b0] sm:$0xff]  ;;  %v1690_v45 = vld [vmem:[%s4887_s4 + $0x1c8] sm:$0xff] }
 0x17a   : > { %2689 = vmatpush1.bf16.msra.mxu1 %v2688_v49  ;;  %v1637_v49 = vld [vmem:[%s4887_s4 + $0x20] sm:$0xff] }
 0x17b   : > { %2691 = vmatprep.subr.bf16.mxu1 %v2690_v50  ;;  %v1633_v50 = vld [vmem:[%s4887_s4] sm:$0xff]  ;;  %v2762_v51 = vpack.c.bf16 %v1637_v49, %v1634_v48  ;;  %v1450_v49 = vld [vmem:[%s4886_s3 + $0x228] sm:$0xff] }
 0x17d   : > { %2763 = vmatprep.subr.bf16.mxu0 %v2762_v51 }
 0x17e   : > { %2693 = vmatpush1.bf16.msra.mxu1 %v2692_v55  ;;  %v2764_v55 = vpack.c.bf16 %v1636_v52, %v1633_v50  ;;  %v1452_v50 = vld [vmem:[%s4886_s3 + $0x238] sm:$0xff] }
 0x17f   : > { %2695 = vmatprep.subr.bf16.mxu1 %v2694_v56  ;;  %v2766_v56 = vpack.c.bf16 %v1643_v54, %v1640_v53  ;;  %v2732_v54 = vpack.c.bf16 %v1447_v14, %v1445_v46  ;;  %v1870_v46 = vld [vmem:[%s4888_s5 + $0x90] sm:$0xff]  ;;  %v1871_v14 = vld [vmem:[%s4888_s5 + $0x98] sm:$0xff] }
 0x180   : > { %2765 = vmatpush1.bf16.msra.mxu0 %v2764_v55 }
 0x181   : > { %2767 = vmatprep.subr.bf16.mxu0 %v2766_v56  ;;  %v2734_v56 = vpack.c.bf16 %v1452_v50, %v1450_v49  ;;  %v1854_v49 = vld [vmem:[%s4888_s5 + $0x10] sm:$0xff]  ;;  %v1855_v50 = vld [vmem:[%s4888_s5 + $0x18] sm:$0xff] }
 0x182   : > { %2697 = vmatpush1.bf16.msra.mxu1 %v2696_v61  ;;  %v2768_v61 = vpack.c.bf16 %v1642_v58, %v1639_v57  ;;  %v1449_v57 = vld [vmem:[%s4886_s3 + $0x220] sm:$0xff]  ;;  %v1451_v58 = vld [vmem:[%s4886_s3 + $0x230] sm:$0xff] }
 0x183   : > { %2699 = vmatprep.subr.bf16.mxu1 %v2698_v62  ;;  %v2770_v62 = vpack.c.bf16 %v1649_v60, %v1646_v59  ;;  %v1454_v60 = vld [vmem:[%s4886_s3 + $0x248] sm:$0xff] }
 0x184   : > { %2769 = vmatpush1.bf16.msra.mxu0 %v2768_v61  ;;  %v1456_v61 = vld [vmem:[%s4886_s3 + $0x258] sm:$0xff] }
 0x185   : > { %2771 = vmatprep.subr.bf16.mxu0 %v2770_v62  ;;  %v2736_v62 = vpack.c.bf16 %v1451_v58, %v1449_v57  ;;  %v1874_v57 = vld [vmem:[%s4888_s5 + $0xb0] sm:$0xff]  ;;  %v1875_v58 = vld [vmem:[%s4888_s5 + $0xb8] sm:$0xff] }
 0x186   : > { %2701 = vmatpush1.bf16.msra.mxu1 %v2700_v3  ;;  %v2772_v3 = vpack.c.bf16 %v1648_v0, %v1645_v63  ;;  %v2738_v63 = vpack.c.bf16 %v1456_v61, %v1454_v60  ;;  %v1453_v0 = vld [vmem:[%s4886_s3 + $0x240] sm:$0xff]  ;;  %v2844_v60 = vpack.c.bf16 %v1875_v58, %v1874_v57  ;;  %v1858_v61 = vld [vmem:[%s4888_s5 + $0x30] sm:$0xff] }
 0x187   : > { %2703 = vmatprep.subr.bf16.mxu1 %v2702_v4  ;;  %v2774_v4 = vpack.c.bf16 %v1655_v2, %v1652_v1  ;;  %v1455_v1 = vld [vmem:[%s4886_s3 + $0x250] sm:$0xff]  ;;  %v1458_v2 = vld [vmem:[%s4886_s3 + $0x268] sm:$0xff] }
 0x188   : > { %2773 = vmatpush1.bf16.msra.mxu0 %v2772_v3  ;;  %v1460_v3 = vld [vmem:[%s4886_s3 + $0x278] sm:$0xff]  ;;  %v1866_v58 = vld [vmem:[%s4888_s5 + $0x70] sm:$0xff] }
 0x189   : > { %2775 = vmatprep.subr.bf16.mxu0 %v2774_v4  ;;  %v2740_v4 = vpack.c.bf16 %v1455_v1, %v1453_v0  ;;  %v1877_v0 = vld [vmem:[%s4888_s5 + $0xc8] sm:$0xff] }
 0x18a   : > { %2705 = vmatpush1.bf16.msra.mxu1 %v2704_v10  ;;  %v2776_v10 = vpack.c.bf16 %v1654_v6, %v1651_v5  ;;  %v2742_v5 = vpack.c.bf16 %v1460_v3, %v1458_v2  ;;  %v1457_v6 = vld [vmem:[%s4886_s3 + $0x260] sm:$0xff] }
 0x18b   : > { %2707 = vmatprep.subr.bf16.mxu1 %v2706_v11  ;;  %v2778_v11 = vpack.c.bf16 %v1661_v9, %v1658_v8  ;;  %v1459_v8 = vld [vmem:[%s4886_s3 + $0x270] sm:$0xff]  ;;  %v1462_v9 = vld [vmem:[%s4886_s3 + $0x288] sm:$0xff]  ;;  %v1860_v3 = vld [vmem:[%s4888_s5 + $0x40] sm:$0xff] }
 0x18c   : > { %2777 = vmatpush1.bf16.msra.mxu0 %v2776_v10  ;;  %v1464_v10 = vld [vmem:[%s4886_s3 + $0x298] sm:$0xff] }
 0x18d   : > { %2779 = vmatprep.subr.bf16.mxu0 %v2778_v11  ;;  %v2744_v11 = vpack.c.bf16 %v1459_v8, %v1457_v6  ;;  %v1879_v6 = vld [vmem:[%s4888_s5 + $0xd8] sm:$0xff] }
 0x18e   : > { %2709 = vmatpush1.bf16.msra.mxu1 %v2708_v17  ;;  %v2780_v17 = vpack.c.bf16 %v1660_v13, %v1657_v12  ;;  %v2746_v12 = vpack.c.bf16 %v1464_v10, %v1462_v9  ;;  %v1461_v13 = vld [vmem:[%s4886_s3 + $0x280] sm:$0xff]  ;;  %v1862_v10 = vld [vmem:[%s4888_s5 + $0x50] sm:$0xff] }
 0x18f   : > { %2711 = vmatprep.subr.bf16.mxu1 %v2710_v18  ;;  %v2782_v18 = vpack.c.bf16 %v1667_v16, %v1664_v15  ;;  %v1463_v15 = vld [vmem:[%s4886_s3 + $0x290] sm:$0xff]  ;;  %v1466_v16 = vld [vmem:[%s4886_s3 + $0x2a8] sm:$0xff] }
 0x190   : > { %2781 = vmatpush1.bf16.msra.mxu0 %v2780_v17  ;;  %v1468_v17 = vld [vmem:[%s4886_s3 + $0x2b8] sm:$0xff] }
 0x191   : > { %2783 = vmatprep.subr.bf16.mxu0 %v2782_v18  ;;  %v2748_v18 = vpack.c.bf16 %v1463_v15, %v1461_v13  ;;  %v1881_v13 = vld [vmem:[%s4888_s5 + $0xe8] sm:$0xff] }
 0x192   : > { %2713 = vmatpush1.bf16.msra.mxu1 %v2712_v23  ;;  %v2784_v23 = vpack.c.bf16 %v1666_v20, %v1663_v19  ;;  %v2750_v19 = vpack.c.bf16 %v1468_v17, %v1466_v16  ;;  %v1465_v20 = vld [vmem:[%s4886_s3 + $0x2a0] sm:$0xff] }
 0x193   : > { %2715 = vmatprep.subr.bf16.mxu1 %v2714_v33  ;;  %v2786_v33 = vpack.c.bf16 %v1673_v22, %v1670_v21  ;;  %v1467_v21 = vld [vmem:[%s4886_s3 + $0x2b0] sm:$0xff]  ;;  %v1470_v22 = vld [vmem:[%s4886_s3 + $0x2c8] sm:$0xff]  ;;  %v1864_v17 = vld [vmem:[%s4888_s5 + $0x60] sm:$0xff] }
 0x194   : > { %2785 = vmatpush1.bf16.msra.mxu0 %v2784_v23  ;;  %v1472_v23 = vld [vmem:[%s4886_s3 + $0x2d8] sm:$0xff] }
 0x195   : > { %2787 = vmatprep.subr.bf16.mxu0 %v2786_v33  ;;  %v2752_v33 = vpack.c.bf16 %v1467_v21, %v1465_v20  ;;  %v1635_v20 = vld [vmem:[%s4887_s4 + $0x10] sm:$0xff]  ;;  %v1638_v21 = vld [vmem:[%s4887_s4 + $0x28] sm:$0xff] }
 0x196   : > { %2717 = vmatpush1.bf16.msra.mxu1 %v2716_v28  ;;  %v2788_v28 = vpack.c.bf16 %v1672_v25, %v1669_v24  ;;  %v2754_v24 = vpack.c.bf16 %v1472_v23, %v1470_v22  ;;  %v1469_v25 = vld [vmem:[%s4886_s3 + $0x2c0] sm:$0xff] }
 0x197   : > { %2719 = vmatprep.subr.bf16.mxu1 %v2718_v29  ;;  %v2790_v29 = vpack.c.bf16 %v1679_v27, %v1676_v26  ;;  %v1471_v26 = vld [vmem:[%s4886_s3 + $0x2d0] sm:$0xff]  ;;  %v1474_v27 = vld [vmem:[%s4886_s3 + $0x2e8] sm:$0xff] }
 0x198   : > { %2789 = vmatpush1.bf16.msra.mxu0 %v2788_v28  ;;  %v1476_v28 = vld [vmem:[%s4886_s3 + $0x2f8] sm:$0xff] }
 0x199   : > { %2791 = vmatprep.subr.bf16.mxu0 %v2790_v29  ;;  %v2756_v29 = vpack.c.bf16 %v1471_v26, %v1469_v25  ;;  %v1641_v26 = vld [vmem:[%s4887_s4 + $0x40] sm:$0xff] }
 0x19a   : > { %2721 = vmatpush1.bf16.msra.mxu1 %v2720_v34  ;;  %v2792_v34 = vpack.c.bf16 %v1678_v36, %v1675_v30  ;;  %v2758_v30 = vpack.c.bf16 %v1476_v28, %v1474_v27  ;;  %v1473_v36 = vld [vmem:[%s4886_s3 + $0x2e0] sm:$0xff]  ;;  %v1644_v27 = vld [vmem:[%s4887_s4 + $0x58] sm:$0xff] }
 0x19b   : > { %2723 = vmatprep.subr.bf16.mxu1 %v2722_v35  ;;  %v2794_v35 = vpack.c.bf16 %v1685_v32, %v1682_v31  ;;  %v1475_v31 = vld [vmem:[%s4886_s3 + $0x2f0] sm:$0xff]  ;;  %v2806_v28 = vpack.c.bf16 %v1644_v27, %v1641_v26 }
 0x19c   : > { %2793 = vmatpush1.bf16.msra.mxu0 %v2792_v34  ;;  %v2760_v32 = vpack.c.bf16 %v1475_v31, %v1473_v36  ;;  %v1478_v34 = vld [vmem:[%s4886_s3 + $0x308] sm:$0x1]  ;;  %v1653_v31 = vld [vmem:[%s4887_s4 + $0xa0] sm:$0xff] }
 0x19d   : > { %2795 = vmatprep.subr.bf16.mxu0 %v2794_v35  ;;  %v1477_v35 = vld [vmem:[%s4886_s3 + $0x300] sm:$0x1] }
 0x19e   : > { %2725 = vmatpush1.bf16.msra.mxu1 %v2724_v40  ;;  %v1688_v40 = vld [vmem:[%s4887_s4 + $0x1b8] sm:$0xff] }
 0x19f   : > { %2727 = vmatprep.subr.bf16.mxu1 %v2726_v43  ;;  %v2798_v43 = vpack.c.bf16 %v1691_v41, %v1688_v40  ;;  %v1693_v40 = vld [vmem:[%s4887_s4 + $0x1e0] sm:$0x1]  ;;  %v2899_v41 = vmov 0.0|0.0  }
 0x1a0   : > { %2797 = vmatpush1.bf16.msra.mxu0 %v2796_v42  ;;  %v1868_v42 = vld [vmem:[%s4888_s5 + $0x80] sm:$0xff] }
 0x1a1   : > { %2799 = vmatprep.subr.bf16.mxu0 %v2798_v43  ;;  %v1869_v43 = vld [vmem:[%s4888_s5 + $0x88] sm:$0xff] }
 0x1a2   : > { %2729 = vmatpush1.bf16.msra.mxu1 %v2728_v38  ;;  %v2800_v38 = vpack.c.bf16 %v1690_v45, %v1687_v44  ;;  %v1852_v44 = vld [vmem:[%s4888_s5] sm:$0xff]  ;;  %v2832_v45 = vpack.c.bf16 %v1869_v43, %v1868_v42  ;;  %v1668_v42 = vld [vmem:[%s4887_s4 + $0x118] sm:$0xff] }
 0x1a3   : > { %2731 = vmatprep.subr.bf16.mxu1 %v2730_v47 }
 0x1a4   : > { %2801 = vmatpush1.bf16.msra.mxu0 %v2800_v38  ;;  %v1853_v38 = vld [vmem:[%s4888_s5 + $0x8] sm:$0xff] }
 0x1a5   : > { %2192 = vmatprep.subr.msk.mxu0 %vm357_vm0, %v1694_v39 }
 0x1a8   : > { %2193 = vmatpush1.msk.msra.mxu0 %vm357_vm0, %v1693_v40  ;;  %v1665_v40 = vld [vmem:[%s4887_s4 + $0x100] sm:$0xff] }
 0x1a9   : > { %2802 = vmatprep.subr.bf16.mxu0 %v2899_v41  ;;  %v2818_v43 = vpack.c.bf16 %v1668_v42, %v1665_v40 }
 0x237   : > { %v1159_v47 = vpop.f32.mrb[2].mxu1  ;;  %v4577_v48 = vpop.f32.mrb[4].mxu0 }
 0x238   : > { %v1161_v51 = vpop.f32.mrb[3].mxu1  ;;  %v1374_v52 = vpop.f32.mrb[5].mxu0  ;;  %v1377_v55 = vmax.f32 %v1159_v47, 0.0  ;;  %v1379_v37 = vmax.f32 %v4577_v48, 0.0  ;;  %v2834_v47 = vpack.c.bf16 %v1853_v38, %v1852_v44  ;;  %v2836_v48 = vpack.c.bf16 %v1871_v14, %v1870_v46  ;;  %v1671_v44 = vld [vmem:[%s4887_s4 + $0x130] sm:$0xff]  ;;  %v1677_v46 = vld [vmem:[%s4887_s4 + $0x160] sm:$0xff] }
 0x239   : > { %v1378_v53 = vmax.f32 %v1161_v51, 0.0  ;;  %v1380_v59 = vmax.f32 %v1374_v52, 0.0  ;;  %v1872_v51 = vld [vmem:[%s4888_s5 + $0xa0] sm:$0xff]  ;;  %v1873_v52 = vld [vmem:[%s4888_s5 + $0xa8] sm:$0xff]  ;;  %v1680_v14 = vld [vmem:[%s4887_s4 + $0x178] sm:$0xff] }
 0x23b   : > { %1553 = vmatprep.mubr.f32.mxu1 %v1378_v53  ;;  %v2838_v53 = vpack.c.bf16 %v1855_v50, %v1854_v49  ;;  %v1686_v49 = vld [vmem:[%s4887_s4 + $0x1a8] sm:$0xff] }
 0x23c   : > { %1554 = vmatmul.mubr.f32.vlgmr.msra.gmra.mrb[4].mxu1 %v1377_v55  ;;  %v1856_v55 = vld [vmem:[%s4888_s5 + $0x20] sm:$0xff] }
 0x23d   : > { %2733 = vmatpush1.bf16.msra.mxu1 %v2732_v54  ;;  %2191 = vmatprep.mubr.msk.f32.mxu1 %vm1479_vm3, %v1380_v59  ;;  %v2840_v54 = vpack.c.bf16 %v1873_v52, %v1872_v51  ;;  %v1689_v51 = vld [vmem:[%s4887_s4 + $0x1c0] sm:$0xff]  ;;  %v1692_v52 = vld [vmem:[%s4887_s4 + $0x1d8] sm:$0xff] }
 0x23e   : > { %2735 = vmatprep.subr.bf16.mxu1 %v2734_v56  ;;  %v1857_v56 = vld [vmem:[%s4888_s5 + $0x28] sm:$0xff] }
 0x23f   : > { %v2842_v59 = vpack.c.bf16 %v1857_v56, %v1856_v55  ;;  %v1882_v55 = vld [vmem:[%s4888_s5 + $0xf0] sm:$0xff]  ;;  %v1883_v56 = vld [vmem:[%s4888_s5 + $0xf8] sm:$0xff] }
 0x240   : > { %v2860_v57 = vpack.c.bf16 %v1883_v56, %v1882_v55 }
 0x241   : > { %2737 = vmatpush1.bf16.msra.mxu1 %v2736_v62  ;;  %v1859_v62 = vld [vmem:[%s4888_s5 + $0x38] sm:$0xff] }
 0x242   : > { %2739 = vmatprep.subr.bf16.mxu1 %v2738_v63  ;;  %v1876_v63 = vld [vmem:[%s4888_s5 + $0xc0] sm:$0xff]  ;;  %v2846_v1 = vpack.c.bf16 %v1859_v62, %v1858_v61 }
 0x243   : > { %v2848_v2 = vpack.c.bf16 %v1877_v0, %v1876_v63  ;;  %v1884_v61 = vld [vmem:[%s4888_s5 + $0x100] sm:$0x1] }
 0x245   : > { %2741 = vmatpush1.bf16.msra.mxu1 %v2740_v4  ;;  %v1861_v4 = vld [vmem:[%s4888_s5 + $0x48] sm:$0xff] }
 0x246   : > { %2743 = vmatprep.subr.bf16.mxu1 %v2742_v5  ;;  %v1878_v5 = vld [vmem:[%s4888_s5 + $0xd0] sm:$0xff]  ;;  %v2850_v8 = vpack.c.bf16 %v1861_v4, %v1860_v3 }
 0x247   : > { %v2852_v9 = vpack.c.bf16 %v1879_v6, %v1878_v5  ;;  %v2033_v5 = vld [vmem:[%s4889_s6 + $0x8] sm:$0xff] }
 0x249   : > { %2745 = vmatpush1.bf16.msra.mxu1 %v2744_v11  ;;  %v1863_v11 = vld [vmem:[%s4888_s5 + $0x58] sm:$0xff] }
 0x24a   : > { %2747 = vmatprep.subr.bf16.mxu1 %v2746_v12  ;;  %v1880_v12 = vld [vmem:[%s4888_s5 + $0xe0] sm:$0xff]  ;;  %v2854_v15 = vpack.c.bf16 %v1863_v11, %v1862_v10 }
 0x24b   : > { %v2856_v16 = vpack.c.bf16 %v1881_v13, %v1880_v12 }
 0x24d   : > { %2749 = vmatpush1.bf16.msra.mxu1 %v2748_v18  ;;  %v1865_v18 = vld [vmem:[%s4888_s5 + $0x68] sm:$0xff] }
 0x24e   : > { %2751 = vmatprep.subr.bf16.mxu1 %v2750_v19  ;;  %v2858_v19 = vpack.c.bf16 %v1865_v18, %v1864_v17 }
 0x251   : > { %2753 = vmatpush1.bf16.msra.mxu1 %v2752_v33 }
 0x252   : > { %2755 = vmatprep.subr.bf16.mxu1 %v2754_v24  ;;  %v2803_v24 = vpack.c.bf16 %v1638_v21, %v1635_v20 }
 0x255   : > { %2757 = vmatpush1.bf16.msra.mxu1 %v2756_v29  ;;  %v1647_v29 = vld [vmem:[%s4887_s4 + $0x70] sm:$0xff] }
 0x256   : > { %2759 = vmatprep.subr.bf16.mxu1 %v2758_v30  ;;  %v1650_v30 = vld [vmem:[%s4887_s4 + $0x88] sm:$0xff] }
 0x257   : > { %v2809_v36 = vpack.c.bf16 %v1650_v30, %v1647_v29 }
 0x259   : > { %2761 = vmatpush1.bf16.msra.mxu1 %v2760_v32  ;;  %v1656_v32 = vld [vmem:[%s4887_s4 + $0xb8] sm:$0xff] }
 0x25a   : > { %2189 = vmatprep.subr.msk.mxu1 %vm357_vm0, %v1478_v34  ;;  %v2812_v34 = vpack.c.bf16 %v1656_v32, %v1653_v31 }
 0x25d   : > { %2190 = vmatpush1.msk.msra.mxu1 %vm357_vm0, %v1477_v35  ;;  %v1659_v35 = vld [vmem:[%s4887_s4 + $0xd0] sm:$0xff] }
 0x25e   : > { %1625 = vmatmul.mubr.f32.vlgmr.msra.gmra.mrb[4].mxu1 %v1379_v37  ;;  %2833 = vmatprep.subr.bf16.mxu1 %v2832_v45  ;;  %v1662_v37 = vld [vmem:[%s4887_s4 + $0xe8] sm:$0xff] }
 0x25f   : > { %2835 = vmatpush3.bf16.msra.mxu1 %v2834_v47  ;;  %v2815_v39 = vpack.c.bf16 %v1662_v37, %v1659_v35  ;;  %v1674_v45 = vld [vmem:[%s4887_s4 + $0x148] sm:$0xff]  ;;  %v2824_v47 = vpack.c.bf16 %v1680_v14, %v1677_v46 }
 0x260   : > { %2837 = vmatprep.subr.bf16.mxu1 %v2836_v48  ;;  %v2821_v38 = vpack.c.bf16 %v1674_v45, %v1671_v44  ;;  %v1683_v48 = vld [vmem:[%s4887_s4 + $0x190] sm:$0xff] }
 0x261   : > { %v2827_v50 = vpack.c.bf16 %v1686_v49, %v1683_v48 }
 0x263   : > { %2839 = vmatpush3.bf16.msra.mxu1 %v2838_v53  ;;  %v2830_v53 = vpack.c.bf16 %v1692_v52, %v1689_v51 }
 0x264   : > { %2841 = vmatprep.subr.bf16.mxu1 %v2840_v54  ;;  %v1695_v54 = vld [vmem:[%s4887_s4 + $0x1f0] sm:$0x1] }
 0x267   : > { %2843 = vmatpush3.bf16.msra.mxu1 %v2842_v59  ;;  %v1867_v59 = vld [vmem:[%s4888_s5 + $0x78] sm:$0xff] }
 0x268   : > { %2845 = vmatprep.subr.bf16.mxu1 %v2844_v60  ;;  %v2862_v60 = vpack.c.bf16 %v1867_v59, %v1866_v58 }
 0x26b   : > { %2847 = vmatpush3.bf16.msra.mxu1 %v2846_v1 }
 0x26c   : > { %2849 = vmatprep.subr.bf16.mxu1 %v2848_v2 }
 0x26f   : > { %2851 = vmatpush3.bf16.msra.mxu1 %v2850_v8  ;;  %v2034_v8 = vld [vmem:[%s4889_s6 + $0x10] sm:$0x1] }
 0x270   : > { %2853 = vmatprep.subr.bf16.mxu1 %v2852_v9 }
 0x273   : > { %2855 = vmatpush3.bf16.msra.mxu1 %v2854_v15 }
 0x274   : > { %2857 = vmatprep.subr.bf16.mxu1 %v2856_v16 }
 0x277   : > { %2859 = vmatpush3.bf16.msra.mxu1 %v2858_v19 }
 0x278   : > { %2861 = vmatprep.subr.bf16.mxu1 %v2860_v57 }
 0x27b   : > { %2863 = vmatpush3.bf16.msra.mxu1 %v2862_v60 }
 0x331   : > { %v1626_v22 = vpop.f32.mrb[4].mxu1 }
 0x332   : > { %v1628_v23 = vpop.f32.mrb[5].mxu1  ;;  %v1631_v25 = vmax.f32 %v1626_v22, 0.0 }
 0x333   : > { %v1632_v33 = vmax.f32 %v1628_v23, 0.0 }
 0x335   : > { %2194 = vmatprep.mubr.msk.f32.mxu0 %vm935_vm2, %v1632_v33 }
 0x336   : > { %1773 = vmatmul.mubr.f32.vlgmr.msra.gmra.mrb[6].mxu0 %v1631_v25 }
 0x337   : > { %2804 = vmatpush1.bf16.msra.mxu0 %v2803_v24  ;;  %2196 = vmatprep.mubr.msk.f32.mxu0 %vm935_vm2, %v1632_v33 }
 0x338   : > { %2805 = vmatprep.subr.bf16.mxu0 %v2899_v41 }
 0x33b   : > { %2807 = vmatpush1.bf16.msra.mxu0 %v2806_v28 }
 0x33c   : > { %2808 = vmatprep.subr.bf16.mxu0 %v2899_v41 }
 0x33f   : > { %2810 = vmatpush1.bf16.msra.mxu0 %v2809_v36 }
 0x340   : > { %2811 = vmatprep.subr.bf16.mxu0 %v2899_v41 }
 0x343   : > { %2813 = vmatpush1.bf16.msra.mxu0 %v2812_v34 }
 0x344   : > { %2814 = vmatprep.subr.bf16.mxu0 %v2899_v41 }
 0x347   : > { %2816 = vmatpush1.bf16.msra.mxu0 %v2815_v39 }
 0x348   : > { %2817 = vmatprep.subr.bf16.mxu0 %v2899_v41 }
 0x34b   : > { %2819 = vmatpush1.bf16.msra.mxu0 %v2818_v43 }
 0x34c   : > { %2820 = vmatprep.subr.bf16.mxu0 %v2899_v41 }
 0x34f   : > { %2822 = vmatpush1.bf16.msra.mxu0 %v2821_v38 }
 0x350   : > { %2823 = vmatprep.subr.bf16.mxu0 %v2899_v41 }
 0x353   : > { %2825 = vmatpush1.bf16.msra.mxu0 %v2824_v47 }
 0x354   : > { %2826 = vmatprep.subr.bf16.mxu0 %v2899_v41 }
 0x357   : > { %2828 = vmatpush1.bf16.msra.mxu0 %v2827_v50 }
 0x358   : > { %2829 = vmatprep.subr.bf16.mxu0 %v2899_v41 }
 0x35b   : > { %2831 = vmatpush1.bf16.msra.mxu0 %v2830_v53 }
 0x35c   : > { %1819 = vmatprep.subr.mxu0 %v2898_v7 }
 0x35f   : > { %2195 = vmatpush1.msk.msra.mxu0 %vm357_vm0, %v1695_v54 }
 0x360   : > { %1844 = vmatmul.mubr.f32.vlgmr.msra.gmra.mrb[8].mxu0 %v1631_v25  ;;  %2244 = vmatprep.subr.mxu0 %v2898_v7 }
 0x361   : > { %2245 = vmatpush3.msk.msra.mxu0 %vm357_vm0, %v1884_v61  ;;  %2246 = vmatprep.mubr.msk.f32.mxu0 %vm2900_vm4, %v2898_v7 }
 0x362   : > { %2864 = vmatprep.subr.bf16.mxu0 %v2899_v41  ;;  %v2032_v41 = vld [vmem:[%s4889_s6] sm:$0xff] }
 0x363   : > { %v2865_v6 = vpack.c.bf16 %v2033_v5, %v2032_v41 }
 0x409   : > { %v1774_v62 = vpop.f32.mrb[6].mxu0 }
 0x40a   : > { %v1776_v63 = vpop.f32.mrb[7].mxu0  ;;  %v1849_v1 = vmax.f32 %v1774_v62, 0.0 }
 0x40b   : > { %v1850_v0 = vmax.f32 %v1776_v63, 0.0 }
 0x40d   : > { %1955 = vmatprep.mubr.f32.mxu1 %v1850_v0 }
 0x40e   : > { %1956 = vmatmul.mubr.f32.vlgmr.msra.gmra.mrb[6].mxu1 %v1849_v1 }
 0x433   : > { %v1845_v2 = vpop.f32.mrb[8].mxu0 }
 0x434   : > { %v1851_v3 = vmax.f32 %v1845_v2, 0.0  ;;  %v1847_v4 = vpop.f32.mrb[9].mxu0 }
 0x436   : > { %2247 = vmatmul.mubr.msk.f32.vlgmr.msra.gmra.mrb[10].mxu0 %vm1479_vm3, %v1851_v3 }
 0x437   : > { %2255 = vmatprep.mubr.msk.f32.mxu0 %vm2900_vm4, %v2898_v7  ;;  %2866 = vmatpush3.bf16.msra.mxu0 %v2865_v6 }
 0x438   : > { %2253 = vmatprep.subr.mxu0 %v2898_v7 }
 0x43b   : > { %2254 = vmatpush3.msk.msra.mxu0 %vm357_vm0, %v2034_v8 }
 0x4e1   : > { %v2235_v9 = vpop.f32.mrb[6].mxu1 }
 0x4e2   : > { %v2236_v10 = vpop.f32.mrb[7].mxu1 }
 0x4e3   : > { %v2237_v11 = vadd.f32 %v2236_v10, %v2235_v9 }
 0x509   : > { %v2027_v12 = vpop.f32.mrb[10].mxu0 }
 0x50a   : > { %v2028_v13 = vadd.f32 %v2237_v11, %v2027_v12  ;;  %v2248_v15 = vpop.f32.mrb[11].mxu0 }
 0x50c   : > { %v2031_v16 = vmax.f32 %v2028_v13, 0.0 }
 0x50e   : > { %2256 = vmatmul.mubr.msk.f32.vlgmr.msra.gmra.mrb[12].mxu0 %vm2035_vm5, %v2031_v16 }
 0x5e1   : > { %v2108_v17 = vpop.f32.mrb[12].mxu0 }
 0x5e2   : > { %2888 = vtanh.f32 %v2108_v17  ;;  %v2257_v18 = vpop.f32.mrb[13].mxu0 }
 0x5ec   : > { %v2889_v7 = vpop.eup %2888 }
 0x5ed   : > { %2113 = vst.msk [vmem:[%s273_s18] sm:$0xff] %vm1479_vm3, %v2889_v7 }
 0x5ee PF: > { %s17_s24 = sadd.s32 1, %s2896_s24  }
 0x5ef   : > { %p14_p4 = scmp.ge.s32.totalorder %s17_s24, 4  }
 0x5f1   :  { %16 = sbr.rel (!%p14_p4) target bundleno = 1 (0x1), region = 78 }

</bundles_post_ra>
